<compile_context>
chip_gen: v5e
topology: v5e:2x2
jax: 0.10.0
libtpu: 0.0.40
codegen_flags: <defaults>
</compile_context>

<pallas_src>
import functools
import math

import jax
import jax.numpy as jnp
from jax.experimental import pallas as pl
from jax.experimental.pallas import tpu as pltpu


def _attention_kernel(h_ref, w1_ref, b1_ref, w2_ref, b2_ref,
                      out_ref, wts_ref, *, scale):
    # h_ref:  (B_BLK, T, D)      w1_ref: (D, D)  (= W1.weight.T)
    # b1_ref: (1, D)             w2_ref: (1, D)  (= w2.weight row, lane-dense)
    # b2_ref: (1, 1) in SMEM
    # out_ref:(B_BLK, D)         wts_ref:(B_BLK, T)  (lane-dense weights)
    b_blk, T, D = h_ref.shape
    h = h_ref[...]                                         # (B_BLK, T, D) f32

    # ---- W1 projection on the MXU with M = B_BLK * T -----------------------
    h2 = h.reshape(b_blk * T, D)
    proj = jnp.tanh(
        jnp.dot(h2, w1_ref[...], preferred_element_type=jnp.float32)
        + b1_ref[...])                                     # (B_BLK*T, D)

    # ---- scores: VPU multiply + lane reduce (skip degenerate N=1 matvec) ---
    proj3 = proj.reshape(b_blk, T, D)
    w2_row = w2_ref[...].reshape(1, 1, D)
    scores = jnp.sum(proj3 * w2_row, axis=-1)              # (B_BLK, T)
    scores = (scores + b2_ref[0, 0]) * scale               # scale = 1/sqrt(D)

    # ---- softmax over the temporal axis (lane axis here) -------------------
    m = jnp.max(scores, axis=-1, keepdims=True)
    e = jnp.exp(scores - m)
    denom = jnp.sum(e, axis=-1, keepdims=True)
    weights = e * pl.reciprocal(denom, approx=False)       # exact: keeps 1e-5

    # ---- pooled output on the MXU: (B,1,T) @ (B,T,D) -> (B,1,D) ------------
    out = jnp.einsum('bqt,btd->bqd', weights[:, None, :], h,
                     preferred_element_type=jnp.float32)

    out_ref[...] = out[:, 0, :].astype(out_ref.dtype)
    wts_ref[...] = weights.astype(wts_ref.dtype)


def attention_layer(hidden_states, w1_t, b1, w2_t, b2, *, b_blk=None):
    """hidden_states: (B, T, D). w1_t = W1.weight.T (D, D); b1 (D,);
    w2_t = w2.weight.T (D, 1) or (D,); b2 (1,).
    Returns (out (B, D), weights (B, T, 1))."""
    B, T, D = hidden_states.shape
    dtype = hidden_states.dtype

    if b_blk is None:
        # MXU-friendly M = b_blk * T >= 256, sublane-aligned (multiple of 8),
        # capped so large batches still give many parallel grid steps.
        target = (256 + T - 1) // T
        b_blk = min(128, max(8, 8 * ((target + 7) // 8)))

    n_blk = (B + b_blk - 1) // b_blk
    b_pad = n_blk * b_blk
    h = hidden_states
    if b_pad != B:
        # Zero-padded rows are numerically safe (softmax over finite scores).
        h = jnp.pad(h, ((0, b_pad - B), (0, 0), (0, 0)))

    b1_2d = b1.reshape(1, D).astype(dtype)
    w2_row = jnp.asarray(w2_t).reshape(1, D).astype(dtype)   # lane-dense row
    b2_2d = jnp.asarray(b2).reshape(1, 1).astype(jnp.float32)

    kernel = functools.partial(_attention_kernel, scale=1.0 / math.sqrt(D))

    out_shapes = (
        jax.ShapeDtypeStruct((b_pad, D), dtype),
        jax.ShapeDtypeStruct((b_pad, T), dtype),   # lane-dense weights slab
    )

    out, wts = pl.pallas_call(
        kernel,
        out_shape=out_shapes,
        grid_spec=pltpu.PrefetchScalarGridSpec(
            num_scalar_prefetch=0,
            grid=(n_blk,),
            in_specs=[
                pl.BlockSpec((b_blk, T, D), lambda i: (i, 0, 0)),    # h block
                pl.BlockSpec((D, D), lambda i: (0, 0)),              # W1.T
                pl.BlockSpec((1, D), lambda i: (0, 0)),              # b1
                pl.BlockSpec((1, D), lambda i: (0, 0)),              # w2 row
                pl.BlockSpec(memory_space=pltpu.MemorySpace.SMEM),   # b2 scalar
            ],
            out_specs=[
                pl.BlockSpec((b_blk, D), lambda i: (i, 0)),          # out
                pl.BlockSpec((b_blk, T), lambda i: (i, 0)),          # weights
            ],
        ),
        compiler_params=pltpu.CompilerParams(
            dimension_semantics=("parallel",),        # megacore-shardable
            vmem_limit_bytes=64 * 1024 * 1024,        # allow large tiles
        ),
    )(h, w1_t, b1_2d, w2_row, b2_2d)

    out = out[:B]
    weights = wts[:B].reshape(B, T, 1)   # restore the module's (B, T, 1) shape
    return out, weights


def _reference(hidden_states, w1_t, b1, w2_t, b2):
    proj = jnp.tanh(hidden_states @ w1_t + b1)
    scores = (proj @ w2_t + b2) / jnp.sqrt(jnp.float32(hidden_states.shape[-1]))
    weights = jax.nn.softmax(scores, axis=1)
    out = jnp.sum(weights * hidden_states, axis=1)
    return out, weights


if __name__ == "__main__":
    B, T, D = 2, 8, 32
    key = jax.random.PRNGKey(0)
    k_h, k_w1, k_b1, k_w2, k_b2 = jax.random.split(key, 5)

    # PyTorch Linear default init: U(-1/sqrt(fan_in), 1/sqrt(fan_in))
    bound1 = 1.0 / math.sqrt(D)
    w1_t = jax.random.uniform(k_w1, (D, D), jnp.float32, -bound1, bound1)  # W1.weight.T
    b1 = jax.random.uniform(k_b1, (D,), jnp.float32, -bound1, bound1)
    w2_t = jax.random.uniform(k_w2, (D, 1), jnp.float32, -bound1, bound1)  # w2.weight.T
    b2 = jax.random.uniform(k_b2, (1,), jnp.float32, -bound1, bound1)

    hidden_states = jax.random.normal(k_h, (B, T, D), jnp.float32)

    out, weights = attention_layer(hidden_states, w1_t, b1, w2_t, b2)
    jax.block_until_ready((out, weights))

    ref_out, ref_w = _reference(hidden_states, w1_t, b1, w2_t, b2)
    assert out.shape == (B, D) and weights.shape == (B, T, 1)
    assert jnp.allclose(out, ref_out, atol=1e-5, rtol=1e-5), "out mismatch"
    assert jnp.allclose(weights, ref_w, atol=1e-5, rtol=1e-5), "weights mismatch"

    print("KERNEL_OK")
</pallas_src>

<mosaic_0001>
module attributes {stable_mosaic.version = 11 : i64} {
  func.func @_attention_kernel(%arg0: i32, %arg1: memref<32x8x32xf32, #tpu.memory_space<vmem>>, %arg2: memref<32x32xf32, #tpu.memory_space<vmem>>, %arg3: memref<1x32xf32, #tpu.memory_space<vmem>>, %arg4: memref<1x32xf32, #tpu.memory_space<vmem>>, %arg5: memref<1x1xf32, #tpu.memory_space<smem>>, %arg6: memref<32x32xf32, #tpu.memory_space<vmem>>, %arg7: memref<32x8xf32, #tpu.memory_space<vmem>>) attributes {dimension_semantics = [#tpu.dimension_semantics<parallel>], iteration_bounds = array<i64: 1>, scalar_prefetch = 0 : i64, scratch_operands = 0 : i64, tpu.core_type = #tpu.core_type<tc>, window_params = [{transform_indices = @transform_0, window_bounds = array<i64: 32, 8, 32>}, {pipeline_mode = #tpu.pipeline_mode<synchronous>, transform_indices = @transform_1, window_bounds = array<i64: 32, 32>}, {pipeline_mode = #tpu.pipeline_mode<synchronous>, transform_indices = @transform_2, window_bounds = array<i64: 1, 32>}, {pipeline_mode = #tpu.pipeline_mode<synchronous>, transform_indices = @transform_3, window_bounds = array<i64: 1, 32>}, {transform_indices = @transform_4, window_bounds = array<i64: 1, 1>}, {transform_indices = @transform_5, window_bounds = array<i64: 32, 32>}, {transform_indices = @transform_6, window_bounds = array<i64: 32, 8>}]} {
    %c0 = arith.constant 0 : index
    %c0_0 = arith.constant 0 : index
    %c0_1 = arith.constant 0 : index
    %0 = vector.load %arg1[%c0, %c0_0, %c0_1] : memref<32x8x32xf32, #tpu.memory_space<vmem>>, vector<32x8x32xf32>
    %1 = vector.shape_cast %0 : vector<32x8x32xf32> to vector<256x32xf32>
    %c0_2 = arith.constant 0 : index
    %c0_3 = arith.constant 0 : index
    %2 = vector.load %arg2[%c0_2, %c0_3] : memref<32x32xf32, #tpu.memory_space<vmem>>, vector<32x32xf32>
    %cst = arith.constant dense<0.000000e+00> : vector<256x32xf32>
    %3 = tpu.matmul %1, %2, %cst {dimension_numbers = #tpu.dot_dimension_numbers<[1], [0], [0], [1], [0, 0, 1, 1], [], []>} : vector<256x32xf32>, vector<32x32xf32>, vector<256x32xf32> -> vector<256x32xf32>
    %c0_4 = arith.constant 0 : index
    %c0_5 = arith.constant 0 : index
    %4 = vector.load %arg3[%c0_4, %c0_5] : memref<1x32xf32, #tpu.memory_space<vmem>>, vector<1x32xf32>
    %5 = vector.broadcast %4 : vector<1x32xf32> to vector<256x32xf32>
    %6 = arith.addf %3, %5 : vector<256x32xf32>
    %7 = math.tanh %6 : vector<256x32xf32>
    %8 = vector.shape_cast %7 : vector<256x32xf32> to vector<32x8x32xf32>
    %c0_6 = arith.constant 0 : index
    %c0_7 = arith.constant 0 : index
    %9 = vector.load %arg4[%c0_6, %c0_7] : memref<1x32xf32, #tpu.memory_space<vmem>>, vector<1x32xf32>
    %10 = vector.shape_cast %9 : vector<1x32xf32> to vector<1x1x32xf32>
    %11 = vector.broadcast %10 : vector<1x1x32xf32> to vector<32x8x32xf32>
    %12 = arith.mulf %8, %11 : vector<32x8x32xf32>
    %cst_8 = arith.constant dense<0.000000e+00> : vector<32x8xf32>
    %13 = vector.multi_reduction <add>, %12, %cst_8 [2] : vector<32x8x32xf32> to vector<32x8xf32>
    %c0_9 = arith.constant 0 : index
    %c0_10 = arith.constant 0 : index
    %14 = memref.load %arg5[%c0_9, %c0_10] : memref<1x1xf32, #tpu.memory_space<smem>>
    %15 = vector.broadcast %14 : f32 to vector<32x8xf32>
    %16 = arith.addf %13, %15 : vector<32x8xf32>
    %cst_11 = arith.constant 0.176776692 : f32
    %17 = vector.broadcast %cst_11 : f32 to vector<32x8xf32>
    %18 = arith.mulf %16, %17 : vector<32x8xf32>
    %cst_12 = arith.constant dense<0xFF800000> : vector<32xf32>
    %19 = vector.multi_reduction <maximumf>, %18, %cst_12 [1] : vector<32x8xf32> to vector<32xf32>
    %20 = vector.shape_cast %19 : vector<32xf32> to vector<32x1xf32>
    %21 = vector.broadcast %20 : vector<32x1xf32> to vector<32x8xf32>
    %22 = arith.subf %18, %21 : vector<32x8xf32>
    %23 = math.exp %22 : vector<32x8xf32>
    %cst_13 = arith.constant dense<0.000000e+00> : vector<32xf32>
    %24 = vector.multi_reduction <add>, %23, %cst_13 [1] : vector<32x8xf32> to vector<32xf32>
    %25 = vector.shape_cast %24 : vector<32xf32> to vector<32x1xf32>
    %26 = tpu.reciprocal %25 : vector<32x1xf32> -> vector<32x1xf32>
    %27 = vector.broadcast %26 : vector<32x1xf32> to vector<32x8xf32>
    %28 = arith.mulf %23, %27 : vector<32x8xf32>
    %29 = vector.shape_cast %28 : vector<32x8xf32> to vector<32x1x8xf32>
    "tpu.trace_start"() <{level = 10 : i32, message = "bqt,btd->bqd"}> : () -> ()
    %cst_14 = arith.constant dense<0.000000e+00> : vector<32x1x32xf32>
    %30 = tpu.matmul %29, %0, %cst_14 {dimension_numbers = #tpu.dot_dimension_numbers<[2], [1], [1], [2], [0, 0, 0, 1, 1, 2], [0], [0]>} : vector<32x1x8xf32>, vector<32x8x32xf32>, vector<32x1x32xf32> -> vector<32x1x32xf32>
    "tpu.trace_stop"() : () -> ()
    %31 = vector.shape_cast %30 : vector<32x1x32xf32> to vector<32x32xf32>
    %c0_15 = arith.constant 0 : index
    %c0_16 = arith.constant 0 : index
    %32 = vector.load %arg6[%c0_15, %c0_16] : memref<32x32xf32, #tpu.memory_space<vmem>>, vector<32x32xf32>
    tpu.vector_store %arg6[%c0_15, %c0_16], %31 {strides = array<i32>} : memref<32x32xf32, #tpu.memory_space<vmem>>, vector<32x32xf32>,
    %c0_17 = arith.constant 0 : index
    %c0_18 = arith.constant 0 : index
    %33 = vector.load %arg7[%c0_17, %c0_18] : memref<32x8xf32, #tpu.memory_space<vmem>>, vector<32x8xf32>
    tpu.vector_store %arg7[%c0_17, %c0_18], %28 {strides = array<i32>} : memref<32x8xf32, #tpu.memory_space<vmem>>, vector<32x8xf32>,
    return
  }
  func.func @transform_0(%arg0: i32) -> (i32, i32, i32) {
    %c0_i32 = arith.constant 0 : i32
    %c0_i32_0 = arith.constant 0 : i32
    %c0_i32_1 = arith.constant 0 : i32
    return %arg0, %c0_i32, %c0_i32_0 : i32, i32, i32
  }
  func.func @transform_1(%arg0: i32) -> (i32, i32) {
    %c0_i32 = arith.constant 0 : i32
    %c0_i32_0 = arith.constant 0 : i32
    %c0_i32_1 = arith.constant 0 : i32
    return %c0_i32, %c0_i32_0 : i32, i32
  }
  func.func @transform_2(%arg0: i32) -> (i32, i32) {
    %c0_i32 = arith.constant 0 : i32
    %c0_i32_0 = arith.constant 0 : i32
    %c0_i32_1 = arith.constant 0 : i32
    return %c0_i32, %c0_i32_0 : i32, i32
  }
  func.func @transform_3(%arg0: i32) -> (i32, i32) {
    %c0_i32 = arith.constant 0 : i32
    %c0_i32_0 = arith.constant 0 : i32
    %c0_i32_1 = arith.constant 0 : i32
    return %c0_i32, %c0_i32_0 : i32, i32
  }
  func.func @transform_4(%arg0: i32) -> (i32, i32) {
    %c0_i32 = arith.constant 0 : i32
    %c0_i32_0 = arith.constant 0 : i32
    %c0_i32_1 = arith.constant 0 : i32
    return %c0_i32, %c0_i32_0 : i32, i32
  }
  func.func @transform_5(%arg0: i32) -> (i32, i32) {
    %c0_i32 = arith.constant 0 : i32
    %c0_i32_0 = arith.constant 0 : i32
    return %arg0, %c0_i32 : i32, i32
  }
  func.func @transform_6(%arg0: i32) -> (i32, i32) {
    %c0_i32 = arith.constant 0 : i32
    %c0_i32_0 = arith.constant 0 : i32
    return %arg0, %c0_i32 : i32, i32
  }
}

</mosaic_0001>

<bundles_post_ra>
// kernel: tpu_custom_call.1
= control target key start
LH: loop header
LB: loop body
LE: loop exit
PB: predicated region body
PF: predicated region fallthrough
CT: control target
= control target key end

     0   :  { %13 = vsyncpa [#allocation4], 0  ;;  %s3339_s0 = inlined_call_operand.hbm [shape: f32[32,8,32], index: 0, kind: input, shape index: {}]   ;;  %s3340_s1 = inlined_call_operand.hbm [shape: f32[32,32], index: 1, kind: input, shape index: {}]   ;;  %s3341_s2 = inlined_call_operand.vmem [shape: f32[1,32], index: 2, kind: input, shape index: {}]   ;;  %s3342_s3 = inlined_call_operand.vmem [shape: f32[1,32], index: 3, kind: input, shape index: {}]   ;;  %s3343_s4 = inlined_call_operand.<no memory space> [shape: f32[1,1], index: 4, kind: input, shape index: {}]   ;;  %s3344_s5 = inlined_call_operand.hbm [shape: f32[32,32], index: 5, kind: output, shape index: {0}]   ;;  %s3345_s6 = inlined_call_operand.vmem [shape: f32[32,8], index: 6, kind: output, shape index: {1}]  }
   0x1   :  { %14 = vsyncpa [#allocation7], 0 }
   0x2   :  { %15 = vsyncpa [#allocation5], 0  ;;  %s20_s23 = sshll.u32 %s3339_s0, 4  ;;  %s2525_s24 = smov [#allocation3]   ;;  %s21_s23 = int_to_ptr.hbm [resolvable:$true] %s20_s23 }
   0x3   :  { %s22_s25 = sshll.u32 %s2525_s24, 4  ;;  %s33_s28 = sshll.u32 %s3340_s1, 4  ;;  %s23_s25 = int_to_ptr.vmem [resolvable:$true] %s22_s25  ;;  %s34_s28 = int_to_ptr.hbm [resolvable:$true] %s33_s28 }
   0x4   :  { %s2526_s29 = smov 128   ;;  %s2527_s30 = smov 8  }
   0x5   :  { %28 = dma.hbm_to_vmem [thread:$0]  %s21_s23, 4096, %s23_s25, [#allocation4], %s2526_s29, %s2526_s29, %s2527_s30  }
   0x6   :  { %s2528_s7 = smov [#allocation6]  }
   0x7   :  { %s35_s8 = sshll.u32 %s2528_s7, 4  ;;  %s36_s8 = int_to_ptr.vmem [resolvable:$true] %s35_s8 }
   0x8   :  { %41 = dma.hbm_to_vmem [thread:$0]  %s34_s28, 512, %s36_s8, [#allocation7], %s2526_s29, %s2526_s29, %s2527_s30  }
   0x9   :  { %2519 = dma.done.wait [#allocation4], 4096  }
   0xa   :  { %2520 = vsyncadd [#allocation4], 4294963200 }
   0xb   :  { %2521 = dma.done.wait [#allocation7], 512  }
   0xc   :  { %2522 = vsyncadd [#allocation7], 4294966784  ;;  %v91_v0 = vld [vmem:[#allocation6 + $0x18] sm:$0xff]  ;;  %v90_v1 = vld [vmem:[#allocation6 + $0x10] sm:$0xff]  ;;  %vm96_vm0 = vcmask 261120   ;;  %vm602_vm1 = vcmask 1041409  }
   0xd   :  { %205 = vmatpush.msra.mxu0 %v91_v0  ;;  %2263 = vmatpush.msra.mxu2 %v91_v0  ;;  %v89_v2 = vld [vmem:[#allocation6 + $0x8] sm:$0xff]  ;;  %v88_v3 = vld [vmem:[#allocation6] sm:$0xff]  ;;  %v82_v6 = vld [vmem:[#allocation3 + $0xd0] sm:$0xff]  ;;  %vm604_vm2 = vcmask 1042434   ;;  %vm606_vm3 = vcmask 1043459   ;;  %vm608_vm4 = vcmask 1044484  }
   0xe   :  { %2264 = vmatpush.msra.mxu3 %v91_v0  ;;  %2262 = vmatpush.msra.mxu1 %v91_v0  ;;  %v56_v4 = vld [vmem:[#allocation3] sm:$0xff]  ;;  %v77_v5 = vld [vmem:[#allocation3 + $0xa8] sm:$0xff]  ;;  %v58_v9 = vld [vmem:[#allocation3 + $0x10] sm:$0xff]  ;;  %vm610_vm5 = vcmask 1045509   ;;  %vm612_vm6 = vcmask 1046534   ;;  %vm614_vm7 = vcmask 1047559  }
   0xf   :  { %206 = vmatpush.msra.mxu0 %v90_v1  ;;  %2266 = vmatpush.msra.mxu2 %v90_v1  ;;  %v72_v7 = vld [vmem:[#allocation3 + $0x80] sm:$0xff]  ;;  %v57_v8 = vld [vmem:[#allocation3 + $0x8] sm:$0xff]  ;;  %v59_v11 = vld [vmem:[#allocation3 + $0x18] sm:$0xff]  ;;  %vm641_vm8 = vcmask 64512   ;;  %s2180_s21 = sshll.u32 %s3344_s5, 4  ;;  %s2181_s21 = int_to_ptr.hbm [resolvable:$true] %s2180_s21 }
  0x10   :  { %2267 = vmatpush.msra.mxu3 %v90_v1  ;;  %2265 = vmatpush.msra.mxu1 %v90_v1  ;;  %v60_v10 = vld [vmem:[#allocation3 + $0x20] sm:$0xff]  ;;  %v61_v12 = vld [vmem:[#allocation3 + $0x28] sm:$0xff]  ;;  %v78_v13 = vld [vmem:[#allocation3 + $0xb0] sm:$0xff] }
  0x11   :  { %207 = vmatpush.msra.mxu0 %v89_v2  ;;  %2269 = vmatpush.msra.mxu2 %v89_v2  ;;  %v83_v14 = vld [vmem:[#allocation3 + $0xd8] sm:$0xff]  ;;  %v73_v15 = vld [vmem:[#allocation3 + $0x88] sm:$0xff]  ;;  %v84_v17 = vld [vmem:[#allocation3 + $0xe0] sm:$0xff] }
  0x12   :  { %2270 = vmatpush.msra.mxu3 %v89_v2  ;;  %2268 = vmatpush.msra.mxu1 %v89_v2  ;;  %v79_v16 = vld [vmem:[#allocation3 + $0xb8] sm:$0xff]  ;;  %v74_v18 = vld [vmem:[#allocation3 + $0x90] sm:$0xff]  ;;  %v85_v19 = vld [vmem:[#allocation3 + $0xe8] sm:$0xff] }
  0x13   :  { %208 = vmatpush.msra.mxu0 %v88_v3  ;;  %2272 = vmatpush.msra.mxu2 %v88_v3  ;;  %v80_v20 = vld [vmem:[#allocation3 + $0xc0] sm:$0xff]  ;;  %v75_v21 = vld [vmem:[#allocation3 + $0x98] sm:$0xff]  ;;  %v86_v22 = vld [vmem:[#allocation3 + $0xf0] sm:$0xff] }
  0x14   :  { %2273 = vmatpush.msra.mxu3 %v88_v3  ;;  %2198 = vmatmul.msk.f32.vlgmr.msra.gmra.mxu0 %vm96_vm0, %v56_v4  ;;  %v81_v23 = vld [vmem:[#allocation3 + $0xc8] sm:$0xff]  ;;  %v76_v24 = vld [vmem:[#allocation3 + $0xa0] sm:$0xff]  ;;  %v87_v25 = vld [vmem:[#allocation3 + $0xf8] sm:$0xff] }
  0x15   :  { %2219 = vmatmul.msk.f32.vlgmr.msra.gmra.mxu2 %vm96_vm0, %v77_v5  ;;  %2224 = vmatmul.msk.f32.vlgmr.msra.gmra.mxu3 %vm96_vm0, %v82_v6  ;;  %v62_v26 = vld [vmem:[#allocation3 + $0x30] sm:$0xff]  ;;  %v63_v27 = vld [vmem:[#allocation3 + $0x38] sm:$0xff]  ;;  %v64_v28 = vld [vmem:[#allocation3 + $0x40] sm:$0xff] }
  0x16   :  { %2271 = vmatpush.msra.mxu1 %v88_v3  ;;  %1227 = vmatpush.msrb.mxu2 %v57_v8  ;;  %v65_v29 = vld [vmem:[#allocation3 + $0x48] sm:$0xff]  ;;  %v66_v30 = vld [vmem:[#allocation3 + $0x50] sm:$0xff]  ;;  %v67_v31 = vld [vmem:[#allocation3 + $0x58] sm:$0xff] }
  0x17   :  { %2214 = vmatmul.msk.f32.vlgmr.msra.gmra.mxu1 %vm96_vm0, %v72_v7  ;;  %1254 = vmatpush.msrb.mxu3 %v58_v9  ;;  %v68_v32 = vld [vmem:[#allocation3 + $0x60] sm:$0xff]  ;;  %v69_v33 = vld [vmem:[#allocation3 + $0x68] sm:$0xff]  ;;  %v70_v34 = vld [vmem:[#allocation3 + $0x70] sm:$0xff] }
  0x18   :  { %1200 = vmatpush.msrb.mxu1 %v56_v4  ;;  %1308 = vmatpush.msra.mxu2 %v60_v10  ;;  %v71_v35 = vld [vmem:[#allocation3 + $0x78] sm:$0xff]  ;;  %v2613_v36 = vld [vmem:[%s3341_s2] ss:$0 sm:$0xff] }
  0x19   :  { %1335 = vmatpush.msra.mxu3 %v61_v12  ;;  %v2620_v41 = vld [vmem:[%s3342_s3] ss:$0 sm:$0xff] }
  0x1a   :  { %1281 = vmatpush.msra.mxu1 %v59_v11 }
  0x1c   :  { %2199 = vmatmul.msk.f32.gmra.mxu0 %vm96_vm0, %v57_v8 }
  0x1d   :  { %2220 = vmatmul.msk.f32.gmra.mxu2 %vm96_vm0, %v78_v13  ;;  %2225 = vmatmul.msk.f32.gmra.mxu3 %vm96_vm0, %v83_v14 }
  0x1f   :  { %2215 = vmatmul.msk.f32.gmra.mxu1 %vm96_vm0, %v73_v15 }
  0x24   :  { %2200 = vmatmul.msk.f32.gmra.mxu0 %vm96_vm0, %v58_v9 }
  0x25   :  { %2221 = vmatmul.msk.f32.gmra.mxu2 %vm96_vm0, %v79_v16  ;;  %2226 = vmatmul.msk.f32.gmra.mxu3 %vm96_vm0, %v84_v17 }
  0x27   :  { %2216 = vmatmul.msk.f32.gmra.mxu1 %vm96_vm0, %v74_v18 }
  0x2c   :  { %2201 = vmatmul.msk.f32.gmra.mxu0 %vm96_vm0, %v59_v11 }
  0x2d   :  { %2227 = vmatmul.msk.f32.gmra.mxu3 %vm96_vm0, %v85_v19  ;;  %2222 = vmatmul.msk.f32.gmra.mxu2 %vm96_vm0, %v80_v20 }
  0x2f   :  { %2217 = vmatmul.msk.f32.gmra.mxu1 %vm96_vm0, %v75_v21 }
  0x34   :  { %2202 = vmatmul.msk.f32.gmra.mxu0 %vm96_vm0, %v60_v10 }
  0x35   :  { %2228 = vmatmul.msk.f32.gmra.mxu3 %vm96_vm0, %v86_v22  ;;  %2223 = vmatmul.msk.f32.gmra.mxu2 %vm96_vm0, %v81_v23 }
  0x37   :  { %2218 = vmatmul.msk.f32.gmra.mxu1 %vm96_vm0, %v76_v24 }
  0x3c   :  { %2203 = vmatmul.msk.f32.gmra.mxu0 %vm96_vm0, %v61_v12 }
  0x3d   :  { %2229 = vmatmul.msk.f32.gmra.mxu3 %vm96_vm0, %v87_v25 }
  0x44   :  { %2204 = vmatmul.msk.f32.gmra.mxu0 %vm96_vm0, %v62_v26 }
  0x4c   :  { %2205 = vmatmul.msk.f32.gmra.mxu0 %vm96_vm0, %v63_v27 }
  0x54   :  { %2206 = vmatmul.msk.f32.gmra.mxu0 %vm96_vm0, %v64_v28 }
  0x5c   :  { %2207 = vmatmul.msk.f32.gmra.mxu0 %vm96_vm0, %v65_v29 }
  0x64   :  { %2208 = vmatmul.msk.f32.gmra.mxu0 %vm96_vm0, %v66_v30 }
  0x6c   :  { %2209 = vmatmul.msk.f32.gmra.mxu0 %vm96_vm0, %v67_v31 }
  0x74   :  { %2210 = vmatmul.msk.f32.gmra.mxu0 %vm96_vm0, %v68_v32 }
  0x7c   :  { %2211 = vmatmul.msk.f32.gmra.mxu0 %vm96_vm0, %v69_v33 }
  0x84   :  { %2212 = vmatmul.msk.f32.gmra.mxu0 %vm96_vm0, %v70_v34 }
  0x8c   :  { %2213 = vmatmul.msk.f32.gmra.mxu0 %vm96_vm0, %v71_v35 }
  0x91   :  { %v210_v37 = vpop.f32.mrf.mxu0 }
  0x92   :  { %v211_v38 = vadd.f32 %v2613_v36, %v210_v37 }
  0x94   :  { %2285 = vtanh.f32 %v211_v38  ;;  %v258_v39 = vpop.f32.mrf.mxu1 }
  0x95   :  { %v259_v40 = vadd.f32 %v2613_v36, %v258_v39 }
  0x97   :  { %2287 = vtanh.f32 %v259_v40 }
  0x98   :  { %v273_v42 = vpop.f32.mrf.mxu2  ;;  %v288_v43 = vpop.f32.mrf.mxu3 }
  0x99   :  { %v274_v44 = vadd.f32 %v2613_v36, %v273_v42  ;;  %v289_v45 = vadd.f32 %v2613_v36, %v288_v43  ;;  %v213_v46 = vpop.f32.mrf.mxu0 }
  0x9a   :  { %v2286_v47 = vpop.eup %2285  ;;  %v214_v49 = vadd.f32 %v2613_v36, %v213_v46 }
  0x9b   :  { %2289 = vtanh.f32 %v274_v44  ;;  %v342_v48 = vmul.f32 %v2286_v47, %v2620_v41 }
  0x9c   :  { %2291 = vtanh.f32 %v289_v45  ;;  %v261_v50 = vpop.f32.mrf.mxu1 }
  0x9d   :  { %v2288_v51 = vpop.eup %2287  ;;  %v374_v52 = vsel %vm96_vm0, %v342_v48, 0.0  ;;  %v262_v53 = vadd.f32 %v2613_v36, %v261_v50 }
  0x9e   :  { %375 = vadd.xlane.f32.xlu0 %v374_v52  ;;  %v358_v54 = vmul.f32 %v2288_v51, %v2620_v41 }
  0x9f   :  { %2293 = vtanh.f32 %v262_v53 }
  0xa0   :  { %2295 = vtanh.f32 %v214_v49  ;;  %v276_v55 = vpop.f32.mrf.mxu2  ;;  %v291_v56 = vpop.f32.mrf.mxu3  ;;  %v422_v57 = vsel %vm96_vm0, %v358_v54, 0.0 }
  0xa1   :  { %v2290_v58 = vpop.eup %2289  ;;  %v277_v59 = vadd.f32 %v2613_v36, %v276_v55  ;;  %v216_v60 = vpop.f32.mrf.mxu0  ;;  %423 = vadd.xlane.f32.xlu1 %v422_v57  ;;  %v292_v1 = vadd.f32 %v2613_v36, %v291_v56 }
  0xa2   :  { %v2292_v61 = vpop.eup %2291  ;;  %v217_v62 = vadd.f32 %v2613_v36, %v216_v60  ;;  %v363_v63 = vmul.f32 %v2290_v58, %v2620_v41 }
  0xa3   :  { %2297 = vtanh.f32 %v277_v59  ;;  %v368_v0 = vmul.f32 %v2292_v61, %v2620_v41 }
  0xa4   :  { %v264_v2 = vpop.f32.mrf.mxu1  ;;  %2299 = vtanh.f32 %v217_v62  ;;  %v437_v5 = vsel %vm96_vm0, %v363_v63, 0.0 }
  0xa5   :  { %v2294_v3 = vpop.eup %2293  ;;  %v452_v4 = vsel %vm96_vm0, %v368_v0, 0.0  ;;  %2301 = vtanh.f32 %v292_v1  ;;  %v265_v15 = vadd.f32 %v2613_v36, %v264_v2 }
  0xa6   :  { %v2296_v6 = vpop.eup %2295  ;;  %453 = vadd.xlane.f32.xlu2 %v452_v4  ;;  %438 = vadd.xlane.f32.xlu0 %v437_v5  ;;  %v359_v7 = vmul.f32 %v2294_v3, %v2620_v41 }
  0xa7   :  { %v343_v13 = vmul.f32 %v2296_v6, %v2620_v41 }
  0xa8   :  { %v279_v8 = vpop.f32.mrf.mxu2  ;;  %v294_v9 = vpop.f32.mrf.mxu3  ;;  %v425_v18 = vsel %vm96_vm0, %v359_v7, 0.0 }
  0xa9   :  { %v2298_v10 = vpop.eup %2297  ;;  %v280_v11 = vadd.f32 %v2613_v36, %v279_v8  ;;  %v219_v12 = vpop.f32.mrf.mxu0  ;;  %v295_v17 = vadd.f32 %v2613_v36, %v294_v9  ;;  %v377_v21 = vsel %vm96_vm0, %v343_v13, 0.0 }
  0xaa   :  { %v364_v14 = vmul.f32 %v2298_v10, %v2620_v41  ;;  %v2300_v16 = vpop.eup %2299  ;;  %v220_v34 = vadd.f32 %v2613_v36, %v219_v12 }
  0xab   :  { %2303 = vtanh.f32 %v280_v11  ;;  %v2302_v22 = vpop.eup %2301  ;;  %v344_v23 = vmul.f32 %v2300_v16, %v2620_v41 }
  0xac   :  { %v440_v19 = vsel %vm96_vm0, %v364_v14, 0.0  ;;  %v267_v20 = vpop.f32.mrf.mxu1  ;;  %2305 = vtanh.f32 %v265_v15  ;;  %v369_v29 = vmul.f32 %v2302_v22, %v2620_v41 }
  0xad   :  { %441 = vadd.xlane.f32.xlu1 %v440_v19  ;;  %2307 = vtanh.f32 %v295_v17  ;;  %v380_v32 = vsel %vm96_vm0, %v344_v23, 0.0  ;;  %v268_v51 = vadd.f32 %v2613_v36, %v267_v20 }
  0xae   :  { %426 = vadd.xlane.f32.xlu2 %v425_v18  ;;  %378 = vadd.xlane.f32.xlu0 %v377_v21  ;;  %v455_v39 = vsel %vm96_vm0, %v369_v29, 0.0 }
  0xb0   :  { %v297_v24 = vpop.f32.mrf.mxu3  ;;  %v282_v25 = vpop.f32.mrf.mxu2 }
  0xb1   :  { %v2304_v26 = vpop.eup %2303  ;;  %v298_v27 = vadd.f32 %v2613_v36, %v297_v24  ;;  %v222_v28 = vpop.f32.mrf.mxu0  ;;  %v283_v33 = vadd.f32 %v2613_v36, %v282_v25 }
  0xb2   :  { %v223_v30 = vadd.f32 %v2613_v36, %v222_v28  ;;  %v365_v31 = vmul.f32 %v2304_v26, %v2620_v41  ;;  %v2306_v35 = vpop.eup %2305 }
  0xb3   :  { %2309 = vtanh.f32 %v298_v27  ;;  %v2308_v38 = vpop.eup %2307  ;;  %v360_v42 = vmul.f32 %v2306_v35, %v2620_v41 }
  0xb4   :  { %v443_v37 = vsel %vm96_vm0, %v365_v31, 0.0  ;;  %2311 = vtanh.f32 %v223_v30  ;;  %v270_v40 = vpop.f32.mrf.mxu1  ;;  %v370_v43 = vmul.f32 %v2308_v38, %v2620_v41 }
  0xb5   :  { %381 = vadd.xlane.f32.xlu1 %v380_v32  ;;  %2313 = vtanh.f32 %v283_v33  ;;  %v271_v47 = vadd.f32 %v2613_v36, %v270_v40  ;;  %v428_v52 = vsel %vm96_vm0, %v360_v42, 0.0 }
  0xb6   :  { %444 = vadd.xlane.f32.xlu2 %v443_v37  ;;  %456 = vadd.xlane.f32.xlu0 %v455_v39  ;;  %2315 = vtanh.f32 %v220_v34  ;;  %v458_v55 = vsel %vm96_vm0, %v370_v43, 0.0 }
  0xb7   :  { %2317 = vtanh.f32 %v271_v47 }
  0xb8   :  { %v300_v44 = vpop.f32.mrf.mxu3  ;;  %v285_v57 = vpop.f32.mrf.mxu2 }
  0xb9   :  { %v2310_v45 = vpop.eup %2309  ;;  %v225_v46 = vpop.f32.mrf.mxu0  ;;  %v301_v49 = vadd.f32 %v2613_v36, %v300_v44  ;;  %v286_v63 = vadd.f32 %v2613_v36, %v285_v57 }
  0xba   :  { %v371_v48 = vmul.f32 %v2310_v45, %v2620_v41  ;;  %v2312_v50 = vpop.eup %2311  ;;  %v226_v60 = vadd.f32 %v2613_v36, %v225_v46 }
  0xbb   :  { %v2314_v53 = vpop.eup %2313  ;;  %2319 = vtanh.f32 %v301_v49  ;;  %v346_v58 = vmul.f32 %v2312_v50, %v2620_v41 }
  0xbc   :  { %v461_v54 = vsel %vm96_vm0, %v371_v48, 0.0  ;;  %v2316_v56 = vpop.eup %2315  ;;  %2321 = vtanh.f32 %v268_v51  ;;  %v366_v59 = vmul.f32 %v2314_v53, %v2620_v41 }
  0xbd   :  { %459 = vadd.xlane.f32.xlu1 %v458_v55  ;;  %v345_v61 = vmul.f32 %v2316_v56, %v2620_v41  ;;  %v2318_v1 = vpop.eup %2317  ;;  %v386_v2 = vsel %vm96_vm0, %v346_v58, 0.0  ;;  %2323 = vtanh.f32 %v226_v60 }
  0xbe   :  { %462 = vadd.xlane.f32.xlu2 %v461_v54  ;;  %429 = vadd.xlane.f32.xlu0 %v428_v52  ;;  %v446_v3 = vsel %vm96_vm0, %v366_v59, 0.0  ;;  %2325 = vtanh.f32 %v286_v63  ;;  %v362_v8 = vmul.f32 %v2318_v1, %v2620_v41 }
  0xbf   :  { %v383_v5 = vsel %vm96_vm0, %v345_v61, 0.0 }
  0xc0   :  { %v303_v7 = vpop.f32.mrf.mxu3  ;;  %v434_v15 = vsel %vm96_vm0, %v362_v8, 0.0 }
  0xc1   :  { %v228_v62 = vpop.f32.mrf.mxu0  ;;  %v2320_v4 = vpop.eup %2319  ;;  %v304_v12 = vadd.f32 %v2613_v36, %v303_v7 }
  0xc2   :  { %v229_v0 = vadd.f32 %v2613_v36, %v228_v62  ;;  %v2322_v6 = vpop.eup %2321  ;;  %v372_v9 = vmul.f32 %v2320_v4, %v2620_v41 }
  0xc3   :  { %v361_v10 = vmul.f32 %v2322_v6, %v2620_v41  ;;  %v2324_v13 = vpop.eup %2323 }
  0xc4   :  { %2327 = vtanh.f32 %v229_v0  ;;  %v2326_v14 = vpop.eup %2325  ;;  %v464_v16 = vsel %vm96_vm0, %v372_v9, 0.0  ;;  %v347_v20 = vmul.f32 %v2324_v13, %v2620_v41 }
  0xc5   :  { %384 = vadd.xlane.f32.xlu1 %v383_v5  ;;  %v431_v18 = vsel %vm96_vm0, %v361_v10, 0.0  ;;  %2329 = vtanh.f32 %v304_v12  ;;  %v367_v19 = vmul.f32 %v2326_v14, %v2620_v41 }
  0xc6   :  { %387 = vadd.xlane.f32.xlu2 %v386_v2  ;;  %447 = vadd.xlane.f32.xlu0 %v446_v3  ;;  %v389_v27 = vsel %vm96_vm0, %v347_v20, 0.0 }
  0xc7   :  { %v449_v25 = vsel %vm96_vm0, %v367_v19, 0.0 }
  0xc9   :  { %v231_v11 = vpop.f32.mrf.mxu0 }
  0xca   :  { %v2328_v17 = vpop.eup %2327  ;;  %v232_v22 = vadd.f32 %v2613_v36, %v231_v11 }
  0xcb   :  { %v348_v21 = vmul.f32 %v2328_v17, %v2620_v41  ;;  %v2330_v26 = vpop.eup %2329 }
  0xcc   :  { %v373_v29 = vmul.f32 %v2330_v26, %v2620_v41  ;;  %v568_v26 = vlaneseq }
  0xcd   :  { %432 = vadd.xlane.f32.xlu1 %v431_v18  ;;  %v392_v28 = vsel %vm96_vm0, %v348_v21, 0.0 }
  0xce   :  { %435 = vadd.xlane.f32.xlu2 %v434_v15  ;;  %465 = vadd.xlane.f32.xlu0 %v464_v16  ;;  %v467_v33 = vsel %vm96_vm0, %v373_v29, 0.0 }
  0xd1   :  { %v234_v23 = vpop.f32.mrf.mxu0 }
  0xd2   :  { %v235_v24 = vadd.f32 %v2613_v36, %v234_v23 }
  0xd4   :  { %2331 = vtanh.f32 %v235_v24 }
  0xd5   :  { %2333 = vtanh.f32 %v232_v22  ;;  %450 = vadd.xlane.f32.xlu1 %v449_v25 }
  0xd6   :  { %390 = vadd.xlane.f32.xlu2 %v389_v27  ;;  %393 = vadd.xlane.f32.xlu0 %v392_v28 }
  0xd9   :  { %v237_v30 = vpop.f32.mrf.mxu0 }
  0xda   :  { %v2332_v31 = vpop.eup %2331  ;;  %v238_v32 = vadd.f32 %v2613_v36, %v237_v30 }
  0xdb   :  { %v2334_v34 = vpop.eup %2333  ;;  %v350_v35 = vmul.f32 %v2332_v31, %v2620_v41 }
  0xdc   :  { %2335 = vtanh.f32 %v238_v32  ;;  %v349_v38 = vmul.f32 %v2334_v34, %v2620_v41 }
  0xdd   :  { %468 = vadd.xlane.f32.xlu1 %v467_v33  ;;  %v398_v37 = vsel %vm96_vm0, %v350_v35, 0.0  ;;  %v2734_v33 = vand.u32 127, %v568_v26 }
  0xde   :  { %399 = vadd.xlane.f32.xlu2 %v398_v37  ;;  %v395_v43 = vsel %vm96_vm0, %v349_v38, 0.0 }
  0xe1   :  { %v240_v39 = vpop.f32.mrf.mxu0 }
  0xe2   :  { %v2336_v40 = vpop.eup %2335  ;;  %v241_v42 = vadd.f32 %v2613_v36, %v240_v39 }
  0xe3   :  { %v351_v44 = vmul.f32 %v2336_v40, %v2620_v41 }
  0xe4   :  { %2337 = vtanh.f32 %v241_v42 }
  0xe5   :  { %396 = vadd.xlane.f32.xlu1 %v395_v43  ;;  %v401_v45 = vsel %vm96_vm0, %v351_v44, 0.0 }
  0xe6   :  { %402 = vadd.xlane.f32.xlu0 %v401_v45 }
  0xe9   :  { %v243_v46 = vpop.f32.mrf.mxu0 }
  0xea   :  { %v2338_v47 = vpop.eup %2337  ;;  %v244_v48 = vadd.f32 %v2613_v36, %v243_v46 }
  0xeb   :  { %v352_v49 = vmul.f32 %v2338_v47, %v2620_v41 }
  0xec   :  { %2339 = vtanh.f32 %v244_v48 }
  0xed   :  { %v404_v50 = vsel %vm96_vm0, %v352_v49, 0.0 }
  0xee   :  { %405 = vadd.xlane.f32.xlu1 %v404_v50 }
  0xf1   :  { %v246_v51 = vpop.f32.mrf.mxu0 }
  0xf2   :  { %v2340_v52 = vpop.eup %2339  ;;  %v247_v53 = vadd.f32 %v2613_v36, %v246_v51 }
  0xf3   :  { %v353_v54 = vmul.f32 %v2340_v52, %v2620_v41 }
  0xf4   :  { %2341 = vtanh.f32 %v247_v53 }
  0xf5   :  { %v407_v55 = vsel %vm96_vm0, %v353_v54, 0.0 }
  0xf6   :  { %408 = vadd.xlane.f32.xlu2 %v407_v55 }
  0xf9   :  { %v249_v56 = vpop.f32.mrf.mxu0 }
  0xfa   :  { %v2342_v57 = vpop.eup %2341  ;;  %v250_v58 = vadd.f32 %v2613_v36, %v249_v56 }
  0xfb   :  { %v354_v59 = vmul.f32 %v2342_v57, %v2620_v41 }
  0xfc   :  { %2343 = vtanh.f32 %v250_v58 }
  0xfd   :  { %v410_v60 = vsel %vm96_vm0, %v354_v59, 0.0 }
  0xfe   :  { %411 = vadd.xlane.f32.xlu0 %v410_v60 }
 0x101   :  { %v252_v61 = vpop.f32.mrf.mxu0 }
 0x102   :  { %v2344_v62 = vpop.eup %2343  ;;  %v253_v63 = vadd.f32 %v2613_v36, %v252_v61 }
 0x103   :  { %v355_v0 = vmul.f32 %v2344_v62, %v2620_v41 }
 0x104   :  { %2345 = vtanh.f32 %v253_v63 }
 0x105   :  { %v413_v1 = vsel %vm96_vm0, %v355_v0, 0.0 }
 0x106   :  { %414 = vadd.xlane.f32.xlu1 %v413_v1 }
 0x109   :  { %v255_v2 = vpop.f32.mrf.mxu0 }
 0x10a   :  { %v2346_v3 = vpop.eup %2345  ;;  %v256_v4 = vadd.f32 %v2613_v36, %v255_v2 }
 0x10b   :  { %v356_v5 = vmul.f32 %v2346_v3, %v2620_v41 }
 0x10c   :  { %2347 = vtanh.f32 %v256_v4 }
 0x10d   :  { %v416_v6 = vsel %vm96_vm0, %v356_v5, 0.0 }
 0x10e   :  { %417 = vadd.xlane.f32.xlu2 %v416_v6 }
 0x111   :  { %v376_v7 = vpop.xlane.xlu0 %375 }
 0x112   :  { %v2348_v8 = vpop.eup %2347 }
 0x113   :  { %v357_v9 = vmul.f32 %v2348_v8, %v2620_v41  ;;  %v2721_v41 = vstv %s3343_s4 }
 0x114   :  { %v424_v11 = vpop.xlane.xlu1 %423  ;;  %v472_v43 = vadd.f32 %v2721_v41, %v376_v7 }
 0x115   :  { %v419_v10 = vsel %vm96_vm0, %v357_v9, 0.0  ;;  %v488_v27 = vadd.f32 %v2721_v41, %v424_v11 }
 0x116   :  { %420 = vadd.xlane.f32.xlu0 %v419_v10 }
 0x117   :  { %v2736_v34 = vmul.f32 0.17677669, %v488_v27 }
 0x119   :  { %v454_v12 = vpop.xlane.xlu2 %453  ;;  %v439_v13 = vpop.xlane.xlu0 %438  ;;  %v586_v48 = vperm.slane %v2736_v34, %v2734_v33 }
 0x11a   :  { %v493_v28 = vadd.f32 %v2721_v41, %v439_v13  ;;  %v498_v47 = vadd.f32 %v2721_v41, %v454_v12 }
 0x11c   :  { %v2738_v35 = vmul.f32 0.17677669, %v493_v28  ;;  %v2782_v7 = vmul.f32 0.17677669, %v498_v47 }
 0x11e   :  { %v591_v49 = vperm.slane %v2738_v35, %v2734_v33 }
 0x120   :  { %v442_v14 = vpop.xlane.xlu1 %441 }
 0x121   :  { %v427_v15 = vpop.xlane.xlu2 %426  ;;  %v379_v16 = vpop.xlane.xlu0 %378  ;;  %v494_v31 = vadd.f32 %v2721_v41, %v442_v14  ;;  %v2793_v14 = vmul.f32 0.17677669, %v472_v43 }
 0x122   :  { %v489_v23 = vadd.f32 %v2721_v41, %v427_v15  ;;  %v473_v54 = vadd.f32 %v2721_v41, %v379_v16 }
 0x123   :  { %v2745_v44 = vmul.f32 0.17677669, %v494_v31 }
 0x124   :  { %v2729_v30 = vmul.f32 0.17677669, %v489_v23 }
 0x125   :  { %v592_v58 = vperm.slane %v2745_v44, %v2734_v33 }
 0x126   :  { %v587_v39 = vperm.slane %v2729_v30, %v2734_v33 }
 0x128   :  { %v2716_v36 = vpop.xlane.xlu1 %381  ;;  %v623_v53 = vsel %vm602_vm1, %v587_v39, %v586_v48 }
 0x129   :  { %v445_v17 = vpop.xlane.xlu2 %444  ;;  %v457_v18 = vpop.xlane.xlu0 %456  ;;  %v474_v8 = vadd.f32 %v2721_v41, %v2716_v36  ;;  %v2799_v36 = vmul.f32 0.17677669, %v473_v54 }
 0x12a   :  { %v495_v37 = vadd.f32 %v2721_v41, %v445_v17  ;;  %v499_v61 = vadd.f32 %v2721_v41, %v457_v18 }
 0x12b   :  { %v2809_v23 = vmul.f32 0.17677669, %v474_v8 }
 0x12c   :  { %v2757_v51 = vmul.f32 0.17677669, %v495_v37  ;;  %v2787_v10 = vmul.f32 0.17677669, %v499_v61  ;;  %v570_v37 = vperm.slane %v2793_v14, %v2734_v33 }
 0x12d   :  { %v572_v47 = vperm.slane %v2809_v23, %v2734_v33 }
 0x12e   :  { %v593_v63 = vperm.slane %v2757_v51, %v2734_v33  ;;  %v597_v26 = vperm.slane %v2787_v10, %v2734_v33 }
 0x130   :  { %v460_v19 = vpop.xlane.xlu1 %459 }
 0x131   :  { %v463_v20 = vpop.xlane.xlu2 %462  ;;  %v430_v21 = vpop.xlane.xlu0 %429  ;;  %v500_v0 = vadd.f32 %v2721_v41, %v460_v19 }
 0x132   :  { %v490_v25 = vadd.f32 %v2721_v41, %v430_v21  ;;  %v501_v3 = vadd.f32 %v2721_v41, %v463_v20 }
 0x133   :  { %v2795_v15 = vmul.f32 0.17677669, %v500_v0 }
 0x134   :  { %v2732_v32 = vmul.f32 0.17677669, %v490_v25  ;;  %v2801_v19 = vmul.f32 0.17677669, %v501_v3 }
 0x136   :  { %v588_v45 = vperm.slane %v2732_v32, %v2734_v33  ;;  %v599_v43 = vperm.slane %v2801_v19, %v2734_v33 }
 0x138   :  { %v385_v22 = vpop.xlane.xlu1 %384  ;;  %v624_v59 = vsel %vm604_vm2, %v588_v45, %v623_v53 }
 0x139   :  { %v2724_v24 = vpop.xlane.xlu2 %387  ;;  %v448_v29 = vpop.xlane.xlu0 %447  ;;  %v475_v11 = vadd.f32 %v2721_v41, %v385_v22  ;;  %v596_v22 = vperm.slane %v2782_v7, %v2734_v33 }
 0x13a   :  { %v496_v55 = vadd.f32 %v2721_v41, %v448_v29  ;;  %v476_v25 = vadd.f32 %v2721_v41, %v2724_v24 }
 0x13b   :  { %v2815_v27 = vmul.f32 0.17677669, %v475_v11 }
 0x13c   :  { %v2778_v4 = vmul.f32 0.17677669, %v496_v55  ;;  %v2834_v48 = vmul.f32 0.17677669, %v476_v25 }
 0x13d   :  { %v573_v54 = vperm.slane %v2815_v27, %v2734_v33 }
 0x13e   :  { %v594_v20 = vperm.slane %v2778_v4, %v2734_v33 }
 0x140   :  { %v433_v38 = vpop.xlane.xlu1 %432 }
 0x141   :  { %v436_v40 = vpop.xlane.xlu2 %435  ;;  %v491_v42 = vadd.f32 %v2721_v41, %v433_v38  ;;  %v466_v57 = vpop.xlane.xlu0 %465  ;;  %v598_v38 = vperm.slane %v2795_v15, %v2734_v33 }
 0x142   :  { %v492_v46 = vadd.f32 %v2721_v41, %v436_v40  ;;  %v502_v16 = vadd.f32 %v2721_v41, %v466_v57 }
 0x143   :  { %v2755_v50 = vmul.f32 0.17677669, %v491_v42  ;;  %v571_v42 = vperm.slane %v2799_v36, %v2734_v33 }
 0x144   :  { %v2759_v52 = vmul.f32 0.17677669, %v492_v46  ;;  %v2823_v39 = vmul.f32 0.17677669, %v502_v16 }
 0x145   :  { %v589_v56 = vperm.slane %v2755_v50, %v2734_v33 }
 0x146   :  { %v590_v60 = vperm.slane %v2759_v52, %v2734_v33 }
 0x147   :  { %v625_v62 = vsel %vm606_vm3, %v589_v56, %v624_v59  ;;  %v603_v59 = vsel %vm602_vm1, %v571_v42, %v570_v37 }
 0x148   :  { %v451_v1 = vpop.xlane.xlu1 %450  ;;  %v626_v2 = vsel %vm608_vm4, %v590_v60, %v625_v62  ;;  %v605_v61 = vsel %vm604_vm2, %v572_v47, %v603_v59  ;;  %v574_v62 = vperm.slane %v2834_v48, %v2734_v33 }
 0x149   :  { %v497_v5 = vadd.f32 %v2721_v41, %v451_v1  ;;  %v627_v6 = vsel %vm610_vm5, %v591_v49, %v626_v2  ;;  %v391_v17 = vpop.xlane.xlu2 %390  ;;  %v394_v31 = vpop.xlane.xlu0 %393  ;;  %v607_v1 = vsel %vm606_vm3, %v573_v54, %v605_v61 }
 0x14a   :  { %v628_v9 = vsel %vm612_vm6, %v592_v58, %v627_v6  ;;  %v477_v28 = vadd.f32 %v2721_v41, %v391_v17  ;;  %v478_v49 = vadd.f32 %v2721_v41, %v394_v31  ;;  %v600_v58 = vperm.slane %v2823_v39, %v2734_v33 }
 0x14b   :  { %v2790_v12 = vmul.f32 0.17677669, %v497_v5  ;;  %v629_v13 = vsel %vm614_vm7, %v593_v63, %v628_v9  ;;  %v609_v11 = vsel %vm608_vm4, %v574_v62, %v607_v1 }
 0x14c   :  { %v648_v18 = vsel %vm641_vm8, %v629_v13, -inf  ;;  %v2840_v55 = vmul.f32 0.17677669, %v477_v28  ;;  %v2853_v63 = vmul.f32 0.17677669, %v478_v49 }
 0x14d   :  { %v595_v21 = vperm.slane %v2790_v12, %v2734_v33  ;;  %649 = vmax.xlane.f32.xlu1 %v648_v18 }
 0x14e   :  { %v575_v2 = vperm.slane %v2840_v55, %v2734_v33  ;;  %v576_v9 = vperm.slane %v2853_v63, %v2734_v33 }
 0x14f   :  { %v630_v29 = vsel %vm602_vm1, %v595_v21, %v594_v20 }
 0x150   :  { %v631_v24 = vsel %vm604_vm2, %v596_v22, %v630_v29  ;;  %v469_v40 = vpop.xlane.xlu1 %468  ;;  %v611_v16 = vsel %vm610_vm5, %v575_v2, %v609_v11 }
 0x151   :  { %v503_v45 = vadd.f32 %v2721_v41, %v469_v40  ;;  %v632_v46 = vsel %vm606_vm3, %v597_v26, %v631_v24  ;;  %v613_v18 = vsel %vm612_vm6, %v576_v9, %v611_v16  ;;  %v400_v22 = vpop.xlane.xlu2 %399 }
 0x152   :  { %v633_v53 = vsel %vm608_vm4, %v598_v38, %v632_v46  ;;  %v480_v28 = vadd.f32 %v2721_v41, %v400_v22 }
 0x153   :  { %v2842_v56 = vmul.f32 0.17677669, %v503_v45  ;;  %v634_v57 = vsel %vm610_vm5, %v599_v43, %v633_v53 }
 0x154   :  { %v635_v0 = vsel %vm612_vm6, %v600_v58, %v634_v57  ;;  %v2876_v38 = vmul.f32 0.17677669, %v480_v28 }
 0x155   :  { %v601_v60 = vperm.slane %v2842_v56, %v2734_v33 }
 0x156   :  { %v578_v46 = vperm.slane %v2876_v38, %v2734_v33 }
 0x157   :  { %v636_v3 = vsel %vm614_vm7, %v601_v60, %v635_v0 }
 0x158   :  { %v397_v5 = vpop.xlane.xlu1 %396  ;;  %v651_v6 = vsel %vm641_vm8, %v636_v3, -inf }
 0x159   :  { %v479_v8 = vadd.f32 %v2721_v41, %v397_v5  ;;  %652 = vmax.xlane.f32.xlu2 %v651_v6  ;;  %v403_v25 = vpop.xlane.xlu0 %402 }
 0x15a   :  { %v481_v29 = vadd.f32 %v2721_v41, %v403_v25 }
 0x15b   :  { %v2865_v13 = vmul.f32 0.17677669, %v479_v8 }
 0x15c   :  { %v2878_v24 = vmul.f32 0.17677669, %v481_v29 }
 0x15d   :  { %v577_v17 = vperm.slane %v2865_v13, %v2734_v33 }
 0x15e   :  { %v579_v47 = vperm.slane %v2878_v24, %v2734_v33 }
 0x15f   :  { %v615_v20 = vsel %vm614_vm7, %v577_v17, %v613_v18 }
 0x160   :  { %v642_v21 = vsel %vm641_vm8, %v615_v20, -inf  ;;  %v616_v60 = vsel %vm602_vm1, %v579_v47, %v578_v46 }
 0x161   :  { %643 = vmax.xlane.f32.xlu2 %v642_v21  ;;  %v406_v26 = vpop.xlane.xlu1 %405 }
 0x162   :  { %v482_v37 = vadd.f32 %v2721_v41, %v406_v26 }
 0x164   :  { %v2881_v43 = vmul.f32 0.17677669, %v482_v37 }
 0x166   :  { %v580_v58 = vperm.slane %v2881_v43, %v2734_v33 }
 0x168   :  { %v617_v1 = vsel %vm604_vm2, %v580_v58, %v616_v60 }
 0x169   :  { %v409_v31 = vpop.xlane.xlu2 %408 }
 0x16a   :  { %v483_v40 = vadd.f32 %v2721_v41, %v409_v31 }
 0x16c   :  { %v2888_v54 = vmul.f32 0.17677669, %v483_v40 }
 0x16e   :  { %v581_v62 = vperm.slane %v2888_v54, %v2734_v33 }
 0x170   :  { %v618_v6 = vsel %vm606_vm3, %v581_v62, %v617_v1 }
 0x171   :  { %v412_v42 = vpop.xlane.xlu0 %411 }
 0x172   :  { %v484_v49 = vadd.f32 %v2721_v41, %v412_v42 }
 0x174   :  { %v2895_v61 = vmul.f32 0.17677669, %v484_v49 }
 0x176   :  { %v582_v3 = vperm.slane %v2895_v61, %v2734_v33 }
 0x178   :  { %v619_v17 = vsel %vm608_vm4, %v582_v3, %v618_v6 }
 0x179   :  { %v415_v45 = vpop.xlane.xlu1 %414 }
 0x17a   :  { %v485_v57 = vadd.f32 %v2721_v41, %v415_v45 }
 0x17c   :  { %v2899_v0 = vmul.f32 0.17677669, %v485_v57 }
 0x17e   :  { %v583_v8 = vperm.slane %v2899_v0, %v2734_v33 }
 0x180   :  { %v620_v20 = vsel %vm610_vm5, %v583_v8, %v619_v17 }
 0x181   :  { %v418_v53 = vpop.xlane.xlu2 %417 }
 0x182   :  { %v486_v59 = vadd.f32 %v2721_v41, %v418_v53 }
 0x184   :  { %v2902_v2 = vmul.f32 0.17677669, %v486_v59 }
 0x186   :  { %v584_v11 = vperm.slane %v2902_v2, %v2734_v33 }
 0x188   :  { %v621_v21 = vsel %vm612_vm6, %v584_v11, %v620_v20 }
 0x189   :  { %v421_v5 = vpop.xlane.xlu0 %420 }
 0x18a   :  { %v487_v9 = vadd.f32 %v2721_v41, %v421_v5  ;;  %v2529_v41 = vmov 0  }
 0x18b   :  { %2282 = vset.pattern.permute.xlu1 %v2529_v41  ;;  %2281 = vset.pattern.permute.xlu2 %v2529_v41 }
 0x18c   :  { %v2912_v16 = vmul.f32 0.17677669, %v487_v9  ;;  %2280 = vset.pattern.permute.xlu0 %v2529_v41 }
 0x18e   :  { %v585_v18 = vperm.slane %v2912_v16, %v2734_v33 }
 0x190   :  { %v622_v22 = vsel %vm614_vm7, %v585_v18, %v621_v21 }
 0x191   :  { %v645_v25 = vsel %vm641_vm8, %v622_v22, -inf }
 0x192   :  { %646 = vmax.xlane.f32.xlu0 %v645_v25 }
 0x1c0   :  { %v650_v26 = vpop.xlane.xlu1 %649 }
 0x1c1   :  { %v676_v28 = vperm.slane %v650_v26, 2  ;;  %v675_v29 = vperm.slane %v650_v26, 1  ;;  %v674_v31 = vperm.slane %v650_v26, 0  ;;  %v679_v45 = vperm.slane %v650_v26, 5 }
 0x1c2   :  { %v678_v46 = vperm.slane %v650_v26, 4  ;;  %v677_v47 = vperm.slane %v650_v26, 3  ;;  %v680_v5 = vperm.slane %v650_v26, 6 }
 0x1c3   :  { %v740_v37 = vsub.f32 %v2732_v32, %v676_v28  ;;  %v739_v40 = vsub.f32 %v2729_v30, %v675_v29  ;;  %v738_v42 = vsub.f32 %v2736_v34, %v674_v31  ;;  %v743_v58 = vsub.f32 %v2738_v35, %v679_v45 }
 0x1c4   :  { %v742_v59 = vsub.f32 %v2759_v52, %v678_v46  ;;  %v741_v60 = vsub.f32 %v2755_v50, %v677_v47  ;;  %v681_v34 = vperm.slane %v650_v26, 7  ;;  %v744_v52 = vsub.f32 %v2745_v44, %v680_v5 }
 0x1c5   :  { %v790_v49 = vmul.f32 1.442695, %v740_v37  ;;  %v788_v53 = vmul.f32 1.442695, %v739_v40  ;;  %v786_v57 = vmul.f32 1.442695, %v738_v42 }
 0x1c6   :  { %v796_v32 = vmul.f32 1.442695, %v743_v58  ;;  %v794_v30 = vmul.f32 1.442695, %v742_v59  ;;  %v792_v3 = vmul.f32 1.442695, %v741_v60  ;;  %v745_v50 = vsub.f32 %v2757_v51, %v681_v34 }
 0x1c7   :  { %2349 = vpow2.f32 %v790_v49  ;;  %v798_v18 = vmul.f32 1.442695, %v744_v52 }
 0x1c8   :  { %2351 = vpow2.f32 %v788_v53  ;;  %v800_v9 = vmul.f32 1.442695, %v745_v50 }
 0x1c9   :  { %2353 = vpow2.f32 %v786_v57 }
 0x1ca   :  { %2355 = vpow2.f32 %v796_v32 }
 0x1cb   :  { %2357 = vpow2.f32 %v794_v30 }
 0x1cc   :  { %v2927_v62 = vpop.xlane.xlu2 %652  ;;  %2359 = vpow2.f32 %v792_v3 }
 0x1cd   :  { %v2929_v1 = vpop.eup %2349  ;;  %v683_v11 = vperm.slane %v2927_v62, 1  ;;  %v682_v21 = vperm.slane %v2927_v62, 0  ;;  %2361 = vpow2.f32 %v800_v9  ;;  %v684_v50 = vperm.slane %v2927_v62, 2 }
 0x1ce   :  { %v2931_v6 = vpop.eup %2351  ;;  %905 = vperm.xlu1 %2282, %v2929_v1   ;;  %2363 = vpow2.f32 %v798_v18  ;;  %v685_v18 = vperm.slane %v2927_v62, 3 }
 0x1cf   :  { %v2934_v35 = vpop.eup %2353  ;;  %902 = vperm.xlu2 %2281, %v2931_v6   ;;  %v747_v41 = vsub.f32 %v2790_v12, %v683_v11  ;;  %v746_v28 = vsub.f32 %v2778_v4, %v682_v21  ;;  %v748_v11 = vsub.f32 %v2782_v7, %v684_v50 }
 0x1d0   :  { %899 = vperm.xlu0 %2280, %v2934_v35   ;;  %v2943_v17 = vpop.eup %2355 }
 0x1d1   :  { %v2947_v22 = vpop.eup %2357  ;;  %v804_v31 = vmul.f32 1.442695, %v747_v41  ;;  %v802_v40 = vmul.f32 1.442695, %v746_v28 }
 0x1d2   :  { %v2950_v51 = vpop.eup %2359 }
 0x1d3   :  { %v2961_v42 = vpop.eup %2361 }
 0x1d4   :  { %v2940_v8 = vpop.xlane.xlu2 %643  ;;  %v2963_v45 = vpop.eup %2363 }
 0x1d5   :  { %v659_v20 = vperm.slane %v2940_v8, 1  ;;  %v662_v25 = vperm.slane %v2940_v8, 4  ;;  %v660_v37 = vperm.slane %v2940_v8, 2  ;;  %v664_v46 = vperm.slane %v2940_v8, 6 }
 0x1d6   :  { %914 = vperm.xlu1 %2282, %v2943_v17   ;;  %v661_v57 = vperm.slane %v2940_v8, 3  ;;  %v665_v59 = vperm.slane %v2940_v8, 7  ;;  %v663_v3 = vperm.slane %v2940_v8, 5 }
 0x1d7   :  { %911 = vperm.xlu2 %2281, %v2947_v22   ;;  %v723_v44 = vsub.f32 %v2799_v36, %v659_v20  ;;  %v726_v29 = vsub.f32 %v2834_v48, %v662_v25  ;;  %v658_v36 = vperm.slane %v2940_v8, 0  ;;  %v724_v4 = vsub.f32 %v2809_v23, %v660_v37 }
 0x1d8   :  { %908 = vperm.xlu0 %2280, %v2950_v51   ;;  %v728_v49 = vsub.f32 %v2853_v63, %v664_v46  ;;  %v729_v63 = vsub.f32 %v2865_v13, %v665_v59  ;;  %v806_v20 = vmul.f32 1.442695, %v748_v11 }
 0x1d9   :  { %v756_v26 = vmul.f32 1.442695, %v723_v44  ;;  %v762_v12 = vmul.f32 1.442695, %v726_v29  ;;  %v722_v47 = vsub.f32 %v2793_v14, %v658_v36  ;;  %v758_v53 = vmul.f32 1.442695, %v724_v4 }
 0x1da   :  { %v766_v23 = vmul.f32 1.442695, %v728_v49  ;;  %v725_v14 = vsub.f32 %v2815_v27, %v661_v57  ;;  %v768_v5 = vmul.f32 1.442695, %v729_v63  ;;  %v727_v27 = vsub.f32 %v2840_v55, %v663_v3 }
 0x1db   :  { %2365 = vpow2.f32 %v756_v26  ;;  %v754_v58 = vmul.f32 1.442695, %v722_v47  ;;  %v749_v55 = vsub.f32 %v2787_v10, %v685_v18 }
 0x1dc   :  { %2367 = vpow2.f32 %v804_v31  ;;  %v760_v34 = vmul.f32 1.442695, %v725_v14  ;;  %v764_v8 = vmul.f32 1.442695, %v727_v27  ;;  %v688_v27 = vperm.slane %v2927_v62, 6 }
 0x1dd   :  { %2369 = vpow2.f32 %v802_v40  ;;  %v808_v25 = vmul.f32 1.442695, %v749_v55 }
 0x1de   :  { %2371 = vpow2.f32 %v762_v12 }
 0x1df   :  { %920 = vperm.xlu2 %2281, %v2961_v42   ;;  %2373 = vpow2.f32 %v758_v53 }
 0x1e0   :  { %917 = vperm.xlu0 %2280, %v2963_v45   ;;  %2375 = vpow2.f32 %v754_v58 }
 0x1e1   :  { %v2969_v48 = vpop.eup %2365  ;;  %2377 = vpow2.f32 %v766_v23 }
 0x1e2   :  { %854 = vperm.xlu1 %2282, %v2969_v48   ;;  %v2976_v60 = vpop.eup %2367  ;;  %2379 = vpow2.f32 %v760_v34 }
 0x1e3   :  { %v2978_v32 = vpop.eup %2369  ;;  %2381 = vpow2.f32 %v768_v5 }
 0x1e4   :  { %v2983_v30 = vpop.eup %2371  ;;  %2383 = vpow2.f32 %v764_v8 }
 0x1e5   :  { %v2989_v52 = vpop.eup %2373  ;;  %2385 = vpow2.f32 %v806_v20  ;;  %v687_v20 = vperm.slane %v2927_v62, 5 }
 0x1e6   :  { %v2991_v9 = vpop.eup %2375  ;;  %2387 = vpow2.f32 %v808_v25 }
 0x1e7   :  { %926 = vperm.xlu2 %2281, %v2976_v60   ;;  %v2996_v13 = vpop.eup %2377 }
 0x1e8   :  { %923 = vperm.xlu0 %2280, %v2978_v32   ;;  %v3001_v21 = vpop.eup %2379 }
 0x1e9   :  { %v3003_v44 = vpop.eup %2381 }
 0x1ea   :  { %863 = vperm.xlu1 %2282, %v2983_v30   ;;  %v3008_v7 = vpop.eup %2383 }
 0x1eb   :  { %v3010_v41 = vpop.eup %2385 }
 0x1ec   :  { %v3014_v28 = vpop.eup %2387 }
 0x1ef   :  { %857 = vperm.xlu2 %2281, %v2989_v52  }
 0x1f0   :  { %851 = vperm.xlu0 %2280, %v2991_v9  }
 0x1f2   :  { %869 = vperm.xlu1 %2282, %v2996_v13  }
 0x1f7   :  { %860 = vperm.xlu2 %2281, %v3001_v21  }
 0x1f8   :  { %872 = vperm.xlu0 %2280, %v3003_v44  }
 0x1ff   :  { %866 = vperm.xlu2 %2281, %v3008_v7  }
 0x200   :  { %929 = vperm.xlu0 %2280, %v3010_v41  }
 0x205   :  { %v647_v26 = vpop.xlane.xlu0 %646 }
 0x206   :  { %v668_v29 = vperm.slane %v647_v26, 2  ;;  %v667_v31 = vperm.slane %v647_v26, 1  ;;  %v666_v37 = vperm.slane %v647_v26, 0  ;;  %v671_v12 = vperm.slane %v647_v26, 5 }
 0x207   :  { %932 = vperm.xlu2 %2281, %v3014_v28   ;;  %v670_v46 = vperm.slane %v647_v26, 4  ;;  %v669_v4 = vperm.slane %v647_v26, 3  ;;  %v672_v34 = vperm.slane %v647_v26, 6 }
 0x208   :  { %v732_v10 = vsub.f32 %v2881_v43, %v668_v29  ;;  %v731_v40 = vsub.f32 %v2878_v24, %v667_v31  ;;  %v730_v36 = vsub.f32 %v2876_v38, %v666_v37  ;;  %v735_v57 = vsub.f32 %v2899_v0, %v671_v12 }
 0x209   :  { %v734_v58 = vsub.f32 %v2895_v61, %v670_v46  ;;  %v733_v59 = vsub.f32 %v2888_v54, %v669_v4  ;;  %v686_v24 = vperm.slane %v2927_v62, 4  ;;  %v673_v38 = vperm.slane %v647_v26, 7 }
 0x20a   :  { %v774_v47 = vmul.f32 1.442695, %v732_v10  ;;  %v772_v49 = vmul.f32 1.442695, %v731_v40  ;;  %v770_v53 = vmul.f32 1.442695, %v730_v36  ;;  %v736_v5 = vsub.f32 %v2902_v2, %v672_v34 }
 0x20b   :  { %v780_v43 = vmul.f32 1.442695, %v735_v57  ;;  %v778_v23 = vmul.f32 1.442695, %v734_v58  ;;  %v776_v63 = vmul.f32 1.442695, %v733_v59  ;;  %v750_v54 = vsub.f32 %v2795_v15, %v686_v24 }
 0x20c   :  { %2389 = vpow2.f32 %v774_v47  ;;  %v737_v61 = vsub.f32 %v2912_v16, %v673_v38  ;;  %v782_v18 = vmul.f32 1.442695, %v736_v5  ;;  %v752_v2 = vsub.f32 %v2823_v39, %v688_v27 }
 0x20d   :  { %2391 = vpow2.f32 %v772_v49  ;;  %v810_v50 = vmul.f32 1.442695, %v750_v54  ;;  %v751_v16 = vsub.f32 %v2801_v19, %v687_v20  ;;  %v689_v31 = vperm.slane %v2927_v62, 7 }
 0x20e   :  { %2393 = vpow2.f32 %v770_v53  ;;  %v784_v11 = vmul.f32 1.442695, %v737_v61  ;;  %v814_v25 = vmul.f32 1.442695, %v752_v2 }
 0x20f   :  { %2395 = vpow2.f32 %v780_v43  ;;  %v812_v29 = vmul.f32 1.442695, %v751_v16  ;;  %v753_v19 = vsub.f32 %v2842_v56, %v689_v31 }
 0x210   :  { %2397 = vpow2.f32 %v778_v23 }
 0x211   :  { %2399 = vpow2.f32 %v776_v63  ;;  %v816_v36 = vmul.f32 1.442695, %v753_v19 }
 0x212   :  { %v3024_v14 = vpop.eup %2389  ;;  %2401 = vpow2.f32 %v810_v50 }
 0x213   :  { %v3026_v3 = vpop.eup %2391  ;;  %881 = vperm.xlu0 %2280, %v3024_v14   ;;  %2403 = vpow2.f32 %v784_v11 }
 0x214   :  { %v3029_v0 = vpop.eup %2393  ;;  %878 = vperm.xlu1 %2282, %v3026_v3   ;;  %2405 = vpow2.f32 %v782_v18 }
 0x215   :  { %875 = vperm.xlu2 %2281, %v3029_v0   ;;  %v3037_v8 = vpop.eup %2395  ;;  %2407 = vpow2.f32 %v814_v25 }
 0x216   :  { %v3040_v55 = vpop.eup %2397  ;;  %2409 = vpow2.f32 %v812_v29 }
 0x217   :  { %v3043_v15 = vpop.eup %2399  ;;  %2411 = vpow2.f32 %v816_v36 }
 0x218   :  { %v3049_v26 = vpop.eup %2401 }
 0x219   :  { %v3052_v37 = vpop.eup %2403 }
 0x21a   :  { %v3055_v10 = vpop.eup %2405 }
 0x21b   :  { %890 = vperm.xlu0 %2280, %v3037_v8   ;;  %v3060_v40 = vpop.eup %2407 }
 0x21c   :  { %887 = vperm.xlu1 %2282, %v3040_v55   ;;  %v3063_v62 = vpop.eup %2409 }
 0x21d   :  { %884 = vperm.xlu2 %2281, %v3043_v15   ;;  %v3066_v46 = vpop.eup %2411 }
 0x223   :  { %935 = vperm.xlu0 %2280, %v3049_v26  }
 0x224   :  { %896 = vperm.xlu1 %2282, %v3052_v37  }
 0x225   :  { %893 = vperm.xlu2 %2281, %v3055_v10  }
 0x229   :  { %v903_v39 = vpop.permute.xlu2 %902 }
 0x22a   :  { %v963_v57 = vperm.slane %v903_v39, %v2734_v33 }
 0x22b   :  { %941 = vperm.xlu0 %2280, %v3060_v40  }
 0x22d   :  { %938 = vperm.xlu2 %2281, %v3063_v62  }
 0x231   :  { %v912_v12 = vpop.permute.xlu2 %911 }
 0x232   :  { %v966_v54 = vperm.slane %v912_v12, %v2734_v33 }
 0x235   :  { %944 = vperm.xlu2 %2281, %v3066_v46  }
 0x239   :  { %v921_v4 = vpop.permute.xlu2 %920 }
 0x23a   :  { %v969_v2 = vperm.slane %v921_v4, %v2734_v33 }
 0x240   :  { %v906_v47 = vpop.permute.xlu1 %905 }
 0x241   :  { %v927_v56 = vpop.permute.xlu2 %926  ;;  %v964_v59 = vperm.slane %v906_v47, %v2734_v33 }
 0x242   :  { %v900_v49 = vpop.permute.xlu0 %899  ;;  %v971_v31 = vperm.slane %v927_v56, %v2734_v33 }
 0x243   :  { %v962_v53 = vperm.slane %v900_v49, %v2734_v33 }
 0x245   :  { %v992_v43 = vsel %vm602_vm1, %v963_v57, %v962_v53 }
 0x246   :  { %v993_v38 = vsel %vm604_vm2, %v964_v59, %v992_v43 }
 0x248   :  { %v915_v24 = vpop.permute.xlu1 %914 }
 0x249   :  { %v858_v63 = vpop.permute.xlu2 %857  ;;  %v967_v27 = vperm.slane %v915_v24, %v2734_v33 }
 0x24a   :  { %v909_v58 = vpop.permute.xlu0 %908  ;;  %v948_v4 = vperm.slane %v858_v63, %v2734_v33 }
 0x24b   :  { %v965_v23 = vperm.slane %v909_v58, %v2734_v33 }
 0x24d   :  { %v994_v34 = vsel %vm606_vm3, %v965_v23, %v993_v38 }
 0x24e   :  { %v995_v5 = vsel %vm608_vm4, %v966_v54, %v994_v34 }
 0x24f   :  { %v996_v18 = vsel %vm610_vm5, %v967_v27, %v995_v5 }
 0x251   :  { %v861_v16 = vpop.permute.xlu2 %860 }
 0x252   :  { %v918_v61 = vpop.permute.xlu0 %917  ;;  %v949_v58 = vperm.slane %v861_v16, %v2734_v33 }
 0x253   :  { %v968_v50 = vperm.slane %v918_v61, %v2734_v33 }
 0x254   :  { %v855_v11 = vpop.permute.xlu1 %854 }
 0x255   :  { %v997_v20 = vsel %vm612_vm6, %v968_v50, %v996_v18  ;;  %v947_v49 = vperm.slane %v855_v11, %v2734_v33 }
 0x256   :  { %v998_v29 = vsel %vm614_vm7, %v969_v2, %v997_v20 }
 0x257   :  { %v1016_v12 = vsel %vm641_vm8, %v998_v29, 0.0 }
 0x259   :  { %v867_v57 = vpop.permute.xlu2 %866 }
 0x25a   :  { %v924_v25 = vpop.permute.xlu0 %923  ;;  %v951_v23 = vperm.slane %v867_v57, %v2734_v33 }
 0x25b   :  { %v970_v19 = vperm.slane %v924_v25, %v2734_v33 }
 0x25c   :  { %v864_v39 = vpop.permute.xlu1 %863 }
 0x25d   :  { %v999_v36 = vsel %vm602_vm1, %v971_v31, %v970_v19  ;;  %v950_v43 = vperm.slane %v864_v39, %v2734_v33 }
 0x25e   :  { %1017 = vadd.xlane.f32.xlu2 %v1016_v12 }
 0x261   :  { %v933_v18 = vpop.permute.xlu2 %932 }
 0x262   :  { %v852_v47 = vpop.permute.xlu0 %851  ;;  %v973_v16 = vperm.slane %v933_v18, %v2734_v33 }
 0x263   :  { %v946_v53 = vperm.slane %v852_v47, %v2734_v33 }
 0x264   :  { %v870_v59 = vpop.permute.xlu1 %869 }
 0x265   :  { %v978_v56 = vsel %vm602_vm1, %v947_v49, %v946_v53  ;;  %v952_v34 = vperm.slane %v870_v59, %v2734_v33 }
 0x266   :  { %v979_v24 = vsel %vm604_vm2, %v948_v4, %v978_v56 }
 0x267   :  { %v980_v38 = vsel %vm606_vm3, %v949_v58, %v979_v24 }
 0x268   :  { %v981_v54 = vsel %vm608_vm4, %v950_v43, %v980_v38 }
 0x269   :  { %v982_v63 = vsel %vm610_vm5, %v951_v23, %v981_v54 }
 0x26a   :  { %v873_v61 = vpop.permute.xlu0 %872  ;;  %v983_v50 = vsel %vm612_vm6, %v952_v34, %v982_v63 }
 0x26b   :  { %v953_v5 = vperm.slane %v873_v61, %v2734_v33 }
 0x26d   :  { %v984_v27 = vsel %vm614_vm7, %v953_v5, %v983_v50 }
 0x26e   :  { %v1010_v11 = vsel %vm641_vm8, %v984_v27, 0.0 }
 0x26f   :  { %1011 = vadd.xlane.f32.xlu1 %v1010_v11  ;;  %v876_v31 = vpop.permute.xlu2 %875 }
 0x270   :  { %v954_v47 = vperm.slane %v876_v31, %v2734_v33 }
 0x272   :  { %v930_v20 = vpop.permute.xlu0 %929 }
 0x273   :  { %v972_v2 = vperm.slane %v930_v20, %v2734_v33 }
 0x275   :  { %v1000_v25 = vsel %vm604_vm2, %v972_v2, %v999_v36 }
 0x276   :  { %v3108_v29 = vsel %vm606_vm3, %v973_v16, %v1000_v25 }
 0x277   :  { %v885_v49 = vpop.permute.xlu2 %884 }
 0x278   :  { %v957_v36 = vperm.slane %v885_v49, %v2734_v33 }
 0x27f   :  { %v894_v38 = vpop.permute.xlu2 %893 }
 0x280   :  { %v960_v54 = vperm.slane %v894_v38, %v2734_v33 }
 0x285   :  { %v882_v19 = vpop.permute.xlu0 %881 }
 0x286   :  { %v879_v39 = vpop.permute.xlu1 %878  ;;  %v956_v53 = vperm.slane %v882_v19, %v2734_v33 }
 0x287   :  { %v955_v12 = vperm.slane %v879_v39, %v2734_v33  ;;  %v939_v38 = vpop.permute.xlu2 %938 }
 0x289   :  { %v985_v4 = vsel %vm602_vm1, %v955_v12, %v954_v47 }
 0x28a   :  { %v986_v57 = vsel %vm604_vm2, %v956_v53, %v985_v4 }
 0x28b   :  { %v987_v43 = vsel %vm606_vm3, %v957_v36, %v986_v57 }
 0x28d   :  { %v891_v56 = vpop.permute.xlu0 %890 }
 0x28e   :  { %v888_v58 = vpop.permute.xlu1 %887  ;;  %v959_v24 = vperm.slane %v891_v56, %v2734_v33 }
 0x28f   :  { %v958_v59 = vperm.slane %v888_v58, %v2734_v33 }
 0x291   :  { %v988_v23 = vsel %vm608_vm4, %v958_v59, %v987_v43 }
 0x292   :  { %v989_v34 = vsel %vm610_vm5, %v959_v24, %v988_v23 }
 0x293   :  { %v990_v5 = vsel %vm612_vm6, %v960_v54, %v989_v34 }
 0x295   :  { %v936_v43 = vpop.permute.xlu0 %935 }
 0x296   :  { %v897_v63 = vpop.permute.xlu1 %896 }
 0x297   :  { %v961_v61 = vperm.slane %v897_v63, %v2734_v33  ;;  %v945_v63 = vpop.permute.xlu2 %944 }
 0x299   :  { %v991_v50 = vsel %vm614_vm7, %v961_v61, %v990_v5 }
 0x29a   :  { %v1013_v27 = vsel %vm641_vm8, %v991_v50, 0.0 }
 0x29b   :  { %1014 = vadd.xlane.f32.xlu0 %v1013_v27 }
 0x2e2   :  { %v1012_v11 = vpop.xlane.xlu1 %1011 }
 0x2e3   :  { %2413 = vrcp.f32 %v1012_v11  ;;  %v1033_v16 = vand.u32 2147483648, %v1012_v11  ;;  %v1031_v31 = vand.u32 2147483647, %v1012_v11  ;;  %vm1027_vm10 = vweird.f32 %v1012_v11 }
 0x2e5   :  { %v1034_v39 = vor.u32 1.1754944e-38, %v1033_v16  ;;  %vm1032_vm12 = vcmp.eq.f32.partialorder %v1031_v31, 8.507059e+37  ;;  %v977_v31 = vperm.slane %v945_v63, %v2734_v33 }
 0x2e9   :  { %v2414_v18 = vpop.eup %2413 }
 0x2ea   :  { %v1023_v20 = vmul.f32 %v2414_v18, %v1012_v11  ;;  %vm1028_vm9 = vweird.f32 %v2414_v18 }
 0x2eb   :  { %vm1029_vm11 = vmor %vm1027_vm10, %vm1028_vm9 }
 0x2ec   :  { %v1024_v2 = vsub.f32 1.0, %v1023_v20 }
 0x2ee   :  { %v1025_v25 = vmul.f32 %v2414_v18, %v1024_v2 }
 0x2f0   :  { %v1026_v19 = vadd.f32 %v2414_v18, %v1025_v25 }
 0x2f2   :  { %v1030_v12 = vsel %vm1029_vm11, %v2414_v18, %v1026_v19 }
 0x2f3   :  { %v3126_v47 = vsel %vm1032_vm12, %v1034_v39, %v1030_v12 }
 0x2f4   :  { %v1083_v49 = vperm.slane %v3126_v47, 1  ;;  %v1082_v53 = vperm.slane %v3126_v47, 0  ;;  %v1084_v4 = vperm.slane %v3126_v47, 2  ;;  %v1085_v36 = vperm.slane %v3126_v47, 3 }
 0x2f5   :  { %v1086_v59 = vperm.slane %v3126_v47, 4 }
 0x2f6   :  { %v1147_v57 = vmul.f32 %v2969_v48, %v1083_v49  ;;  %v1146_v58 = vmul.f32 %v2991_v9, %v1082_v53  ;;  %v1148_v56 = vmul.f32 %v2989_v52, %v1084_v4  ;;  %v1149_v24 = vmul.f32 %v3001_v21, %v1085_v36  ;;  %v942_v52 = vpop.permute.xlu0 %941 }
 0x2f7   :  { %v1150_v23 = vmul.f32 %v2983_v30, %v1086_v59  ;;  %v1088_v48 = vperm.slane %v3126_v47, 6  ;;  %v1087_v9 = vperm.slane %v3126_v47, 5  ;;  %v974_v21 = vperm.slane %v936_v43, %v2734_v33  ;;  %v1018_v30 = vpop.xlane.xlu2 %1017 }
 0x2f8   :  { %1207 = vperm.xlu1 %2282, %v1147_v57   ;;  %1180 = vperm.xlu2 %2281, %v1146_v58   ;;  %v976_v11 = vperm.slane %v942_v52, %v2734_v33  ;;  %vm1055_vm11 = vweird.f32 %v1018_v30 }
 0x2f9   :  { %1234 = vperm.xlu0 %2280, %v1148_v56   ;;  %v1152_v34 = vmul.f32 %v2996_v13, %v1088_v48  ;;  %v1151_v54 = vmul.f32 %v3008_v7, %v1087_v9  ;;  %v1002_v27 = vsel %vm608_vm4, %v974_v21, %v3108_v29  ;;  %v975_v13 = vperm.slane %v939_v38, %v2734_v33 }
 0x2fb   :  { %v1003_v16 = vsel %vm610_vm5, %v975_v13, %v1002_v27 }
 0x2fc   :  { %v1004_v25 = vsel %vm612_vm6, %v976_v11, %v1003_v16 }
 0x2fd   :  { %v1005_v49 = vsel %vm614_vm7, %v977_v31, %v1004_v25 }
 0x2fe   :  { %v1019_v56 = vsel %vm641_vm8, %v1005_v49, 0.0  ;;  %v2423_v49 = vld [vmem:[#allocation3 + $0x60] sm:$0xff] }
 0x300   :  { %1261 = vperm.xlu2 %2281, %v1149_v24  }
 0x301   :  { %1288 = vperm.xlu0 %2280, %v1150_v23  }
 0x308   :  { %1342 = vperm.xlu2 %2281, %v1152_v34   ;;  %v1061_v34 = vand.u32 2147483648, %v1018_v30 }
 0x309   :  { %1315 = vperm.xlu0 %2280, %v1151_v54   ;;  %v1059_v54 = vand.u32 2147483647, %v1018_v30 }
 0x30e   :  { %v1015_v61 = vpop.xlane.xlu0 %1014 }
 0x30f   :  { %2415 = vrcp.f32 %v1015_v61  ;;  %v1047_v7 = vand.u32 2147483648, %v1015_v61  ;;  %v1045_v2 = vand.u32 2147483647, %v1015_v61  ;;  %vm1041_vm14 = vweird.f32 %v1015_v61 }
 0x310   :  { %2417 = vrcp.f32 %v1018_v30 }
 0x311   :  { %v1048_v29 = vor.u32 1.1754944e-38, %v1047_v7  ;;  %vm1046_vm9 = vcmp.eq.f32.partialorder %v1045_v2, 8.507059e+37 }
 0x315   :  { %v2416_v5 = vpop.eup %2415 }
 0x316   :  { %v1037_v50 = vmul.f32 %v2416_v5, %v1015_v61  ;;  %vm1042_vm13 = vweird.f32 %v2416_v5  ;;  %v2418_v39 = vpop.eup %2417  ;;  %v1062_v61 = vor.u32 1.1754944e-38, %v1061_v34 }
 0x317   :  { %vm1043_vm15 = vmor %vm1041_vm14, %vm1042_vm13  ;;  %v1051_v4 = vmul.f32 %v2418_v39, %v1018_v30  ;;  %vm1056_vm10 = vweird.f32 %v2418_v39  ;;  %vm1060_vm13 = vcmp.eq.f32.partialorder %v1059_v54, 8.507059e+37  ;;  %v2427_v54 = vld [vmem:[#allocation3 + $0x58] sm:$0xff] }
 0x318   :  { %v1038_v18 = vsub.f32 1.0, %v1037_v50  ;;  %vm1057_vm12 = vmor %vm1055_vm11, %vm1056_vm10 }
 0x319   :  { %v1052_v43 = vsub.f32 1.0, %v1051_v4 }
 0x31a   :  { %v1039_v20 = vmul.f32 %v2416_v5, %v1038_v18 }
 0x31b   :  { %v1053_v38 = vmul.f32 %v2418_v39, %v1052_v43  ;;  %v2425_v43 = vld [vmem:[#allocation3 + $0x40] sm:$0xff] }
 0x31c   :  { %v1040_v19 = vadd.f32 %v2416_v5, %v1039_v20 }
 0x31d   :  { %v1054_v52 = vadd.f32 %v2418_v39, %v1053_v38  ;;  %v2426_v38 = vld [vmem:[#allocation3 + $0x50] sm:$0xff] }
 0x31e   :  { %v1044_v12 = vsel %vm1043_vm15, %v2416_v5, %v1040_v19 }
 0x31f   :  { %v1049_v53 = vsel %vm1046_vm9, %v1048_v29, %v1044_v12  ;;  %v2422_v29 = vld [vmem:[#allocation3 + $0x48] sm:$0xff] }
 0x320   :  { %v1092_v57 = vperm.slane %v1049_v53, 2  ;;  %v1090_v58 = vperm.slane %v1049_v53, 0  ;;  %v1093_v24 = vperm.slane %v1049_v53, 3  ;;  %v1091_v23 = vperm.slane %v1049_v53, 1 }
 0x321   :  { %v1095_v63 = vperm.slane %v1049_v53, 5  ;;  %v1094_v18 = vperm.slane %v1049_v53, 4 }
 0x322   :  { %1020 = vadd.xlane.f32.xlu1 %v1019_v56  ;;  %v1156_v36 = vmul.f32 %v3024_v14, %v1092_v57  ;;  %v1154_v59 = vmul.f32 %v3029_v0, %v1090_v58  ;;  %v1157_v48 = vmul.f32 %v3043_v15, %v1093_v24  ;;  %v1155_v9 = vmul.f32 %v3026_v3, %v1091_v23 }
 0x323   :  { %v1096_v14 = vperm.slane %v1049_v53, 6  ;;  %v1058_v0 = vsel %vm1057_vm12, %v2418_v39, %v1054_v52  ;;  %v1159_v5 = vmul.f32 %v3037_v8, %v1095_v63  ;;  %v1089_v3 = vperm.slane %v3126_v47, 7  ;;  %v2421_v39 = vld [vmem:[#allocation3 + $0x30] sm:$0xff] }
 0x324   :  { %1450 = vperm.xlu2 %2281, %v1156_v36   ;;  %1396 = vperm.xlu0 %2280, %v1154_v59   ;;  %v1063_v15 = vsel %vm1060_vm13, %v1062_v61, %v1058_v0  ;;  %v1158_v8 = vmul.f32 %v3040_v55, %v1094_v18  ;;  %v2424_v36 = vld [vmem:[#allocation3 + $0x38] sm:$0xff] }
 0x325   :  { %v1160_v21 = vmul.f32 %v3055_v10, %v1096_v14  ;;  %v1099_v50 = vperm.slane %v1063_v15, 1  ;;  %v1098_v27 = vperm.slane %v1063_v15, 0  ;;  %v1153_v11 = vmul.f32 %v3003_v44, %v1089_v3 }
 0x326   :  { %v1102_v10 = vperm.slane %v1063_v15, 4  ;;  %v1101_v7 = vperm.slane %v1063_v15, 3  ;;  %v1097_v44 = vperm.slane %v1049_v53, 7  ;;  %v1105_v2 = vperm.slane %v1063_v15, 7 }
 0x327   :  { %v1163_v30 = vmul.f32 %v2931_v6, %v1099_v50  ;;  %v1162_v13 = vmul.f32 %v2934_v35, %v1098_v27  ;;  %v1104_v6 = vperm.slane %v1063_v15, 6  ;;  %v1100_v55 = vperm.slane %v1063_v15, 2 }
 0x328   :  { %v1166_v20 = vmul.f32 %v2947_v22, %v1102_v10  ;;  %v1165_v47 = vmul.f32 %v2950_v51, %v1101_v7  ;;  %v1161_v35 = vmul.f32 %v3052_v37, %v1097_v44  ;;  %v1169_v16 = vmul.f32 %v2961_v42, %v1105_v2 }
 0x329   :  { %v1168_v25 = vmul.f32 %v2963_v45, %v1104_v6  ;;  %v1164_v22 = vmul.f32 %v2929_v1, %v1100_v55  ;;  %v1103_v19 = vperm.slane %v1063_v15, 5  ;;  %v2428_v15 = vld [vmem:[#allocation3 + $0x70] sm:$0xff] }
 0x32b   :  { %v1167_v37 = vmul.f32 %v2943_v17, %v1103_v19 }
 0x32c   :  { %1477 = vperm.xlu2 %2281, %v1157_v48   ;;  %1423 = vperm.xlu0 %2280, %v1155_v9  }
 0x334   :  { %1558 = vperm.xlu2 %2281, %v1160_v21   ;;  %1531 = vperm.xlu0 %2280, %v1159_v5  }
 0x33b   :  { %1369 = vperm.xlu1 %2282, %v1153_v11  }
 0x33c   :  { %1639 = vperm.xlu2 %2281, %v1163_v30   ;;  %1612 = vperm.xlu0 %2280, %v1162_v13  }
 0x343   :  { %1504 = vperm.xlu1 %2282, %v1158_v8  }
 0x344   :  { %1720 = vperm.xlu2 %2281, %v1166_v20   ;;  %1693 = vperm.xlu0 %2280, %v1165_v47   ;;  %v2429_v20 = vld [vmem:[#allocation3 + $0x88] sm:$0xff]  ;;  %v2430_v47 = vld [vmem:[#allocation3 + $0x78] sm:$0xff] }
 0x34b   :  { %1585 = vperm.xlu1 %2282, %v1161_v35  }
 0x34c   :  { %1801 = vperm.xlu2 %2281, %v1169_v16   ;;  %1774 = vperm.xlu0 %2280, %v1168_v25  }
 0x352   :  { %v1181_v31 = vpop.permute.xlu2 %1180 }
 0x353   :  { %v1182_v51 = vperm.slane %v1181_v31, %v2734_v33  ;;  %1666 = vperm.xlu1 %2282, %v1164_v22  }
 0x355   :  { %2230 = vmatmul.msk.f32.vlgmr.msrb.gmra.mxu1 %vm641_vm8, %v1182_v51 }
 0x356   :  { %1362 = vmatpush.msrb.mxu1 %v2421_v39 }
 0x35a   :  { %v1262_v42 = vpop.permute.xlu2 %1261 }
 0x35b   :  { %v1263_v45 = vperm.slane %v1262_v42, %v2734_v33  ;;  %1747 = vperm.xlu1 %2282, %v1167_v37   ;;  %v2431_v37 = vld [vmem:[#allocation3 + $0xa0] sm:$0xff] }
 0x35d   :  { %2233 = vmatmul.msk.f32.vlgmr.msra.gmra.mxu1 %vm641_vm8, %v1263_v45 }
 0x35e   :  { %1443 = vmatpush.msra.mxu1 %v2422_v29 }
 0x362   :  { %v1343_v1 = vpop.permute.xlu2 %1342 }
 0x363   :  { %v1344_v12 = vperm.slane %v1343_v1, %v2734_v33 }
 0x365   :  { %2236 = vmatmul.msk.f32.vlgmr.msrb.gmra.mxu1 %vm641_vm8, %v1344_v12 }
 0x366   :  { %1524 = vmatpush.msrb.mxu1 %v2423_v49 }
 0x36a   :  { %v1208_v53 = vpop.permute.xlu1 %1207 }
 0x36b   :  { %v1209_v4 = vperm.slane %v1208_v53, %v2734_v33  ;;  %v1235_v57 = vpop.permute.xlu0 %1234 }
 0x36c   :  { %v1236_v17 = vperm.slane %v1235_v57, %v2734_v33 }
 0x36d   :  { %v2138_v58 = vsel %vm602_vm1, %v1209_v4, %v1182_v51  ;;  %2231 = vmatmul.msk.f32.vlgmr.msrb.gmra.mxu2 %vm641_vm8, %v1209_v4  ;;  %v2432_v4 = vld [vmem:[#allocation3 + $0x68] sm:$0xff] }
 0x36e   :  { %v2139_v56 = vsel %vm604_vm2, %v1236_v17, %v2138_v58  ;;  %2232 = vmatmul.msk.f32.vlgmr.msrb.gmra.mxu3 %vm641_vm8, %v1236_v17  ;;  %1389 = vmatpush.msrb.mxu2 %v2424_v36 }
 0x36f   :  { %v2140_v59 = vsel %vm606_vm3, %v1263_v45, %v2139_v56  ;;  %1416 = vmatpush.msrb.mxu3 %v2425_v43  ;;  %v2433_v56 = vld [vmem:[#allocation3 + $0xb8] sm:$0xff] }
 0x373   :  { %v1289_v24 = vpop.permute.xlu0 %1288 }
 0x374   :  { %v1290_v23 = vperm.slane %v1289_v24, %v2734_v33 }
 0x376   :  { %2234 = vmatmul.msk.f32.vlgmr.msra.gmra.mxu2 %vm641_vm8, %v1290_v23  ;;  %v2141_v52 = vsel %vm608_vm4, %v1290_v23, %v2140_v59 }
 0x377   :  { %1470 = vmatpush.msra.mxu2 %v2426_v38 }
 0x37b   :  { %v1316_v48 = vpop.permute.xlu0 %1315 }
 0x37c   :  { %v1317_v9 = vperm.slane %v1316_v48, %v2734_v33 }
 0x37e   :  { %v2142_v34 = vsel %vm610_vm5, %v1317_v9, %v2141_v52  ;;  %2235 = vmatmul.msk.f32.vlgmr.msra.gmra.mxu3 %vm641_vm8, %v1317_v9  ;;  %v3190_v63 = vpop.permute.xlu2 %1450  ;;  %v2434_v52 = vld [vmem:[#allocation3 + $0x80] sm:$0xff] }
 0x37f   :  { %1497 = vmatpush.msra.mxu3 %v2427_v54  ;;  %v2143_v14 = vsel %vm612_vm6, %v1344_v12, %v2142_v34  ;;  %v1452_v36 = vperm.slane %v3190_v63, %v2734_v33  ;;  %v2436_v63 = vld [vmem:[#allocation3 + $0xd0] sm:$0xff] }
 0x386   :  { %v1478_v0 = vpop.permute.xlu2 %1477 }
 0x387   :  { %v3195_v30 = vperm.slane %v1478_v0, %v2734_v33 }
 0x38e   :  { %v1559_v27 = vpop.permute.xlu2 %1558 }
 0x38f   :  { %v3202_v16 = vperm.slane %v1559_v27, %v2734_v33  ;;  %v2438_v27 = vld [vmem:[#allocation3 + $0xa8] sm:$0xff] }
 0x395   :  { %v1021_v61 = vpop.xlane.xlu1 %1020 }
 0x396   :  { %2419 = vrcp.f32 %v1021_v61  ;;  %v1397_v21 = vpop.permute.xlu0 %1396  ;;  %v1075_v10 = vand.u32 2147483648, %v1021_v61  ;;  %v1073_v8 = vand.u32 2147483647, %v1021_v61  ;;  %vm1069_vm15 = vweird.f32 %v1021_v61  ;;  %v1640_v22 = vpop.permute.xlu2 %1639 }
 0x397   :  { %v1398_v5 = vperm.slane %v1397_v21, %v2734_v33 }
 0x398   :  { %v1076_v2 = vor.u32 1.1754944e-38, %v1075_v10  ;;  %vm1074_vm10 = vcmp.eq.f32.partialorder %v1073_v8, 8.507059e+37  ;;  %v2440_v8 = vld [vmem:[#allocation3 + $0xb0] sm:$0xff] }
 0x399   :  { %2238 = vmatmul.msk.f32.vlgmr.msrb.gmra.mxu3 %vm641_vm8, %v1398_v5 }
 0x39a   :  { %1578 = vmatpush.msrb.mxu3 %v2428_v15 }
 0x39c   :  { %v2420_v3 = vpop.eup %2419 }
 0x39d   :  { %v1065_v50 = vmul.f32 %v2420_v3, %v1021_v61  ;;  %vm1070_vm14 = vweird.f32 %v2420_v3 }
 0x39e   :  { %v1424_v11 = vpop.permute.xlu0 %1423  ;;  %vm1071_vm9 = vmor %vm1069_vm15, %vm1070_vm14  ;;  %v1721_v57 = vpop.permute.xlu2 %1720 }
 0x39f   :  { %v1066_v13 = vsub.f32 1.0, %v1065_v50  ;;  %v1425_v18 = vperm.slane %v1424_v11, %v2734_v33  ;;  %v1722_v23 = vperm.slane %v1721_v57, %v2734_v33  ;;  %v2439_v11 = vld [vmem:[#allocation3 + $0xe8] sm:$0xff] }
 0x3a1   :  { %v1067_v7 = vmul.f32 %v2420_v3, %v1066_v13  ;;  %2239 = vmatmul.msk.f32.vlgmr.msra.gmra.mxu1 %vm641_vm8, %v1425_v18  ;;  %2241 = vmatmul.msk.f32.vlgmr.msra.gmra.mxu3 %vm641_vm8, %v3195_v30  ;;  %v2145_v17 = vsel %vm602_vm1, %v1425_v18, %v1398_v5 }
 0x3a2   :  { %1659 = vmatpush.msra.mxu3 %v2429_v20  ;;  %1605 = vmatpush.msra.mxu1 %v2430_v47  ;;  %v2441_v20 = vld [vmem:[#allocation3 + $0xc0] sm:$0xff] }
 0x3a3   :  { %v1068_v44 = vadd.f32 %v2420_v3, %v1067_v7 }
 0x3a5   :  { %v1072_v6 = vsel %vm1071_vm9, %v2420_v3, %v1068_v44 }
 0x3a6   :  { %v1077_v35 = vsel %vm1074_vm10, %v1076_v2, %v1072_v6  ;;  %v1532_v1 = vpop.permute.xlu0 %1531  ;;  %v1802_v0 = vpop.permute.xlu2 %1801 }
 0x3a7   :  { %v1106_v25 = vperm.slane %v1077_v35, 0  ;;  %v1108_v55 = vperm.slane %v1077_v35, 2  ;;  %v1107_v31 = vperm.slane %v1077_v35, 1  ;;  %v1109_v45 = vperm.slane %v1077_v35, 3 }
 0x3a8   :  { %v1111_v29 = vperm.slane %v1077_v35, 5  ;;  %v1110_v49 = vperm.slane %v1077_v35, 4  ;;  %v1112_v59 = vperm.slane %v1077_v35, 6  ;;  %v1113_v24 = vperm.slane %v1077_v35, 7 }
 0x3a9   :  { %v1170_v51 = vmul.f32 %v2978_v32, %v1106_v25  ;;  %v1172_v19 = vmul.f32 %v3010_v41, %v1108_v55  ;;  %2244 = vmatmul.msk.f32.vlgmr.msrb.gmra.mxu3 %vm641_vm8, %v3202_v16  ;;  %v1171_v39 = vmul.f32 %v2976_v60, %v1107_v31  ;;  %v3211_v32 = vperm.slane %v1640_v22, %v2734_v33  ;;  %v2442_v31 = vld [vmem:[#allocation3 + $0xc8] sm:$0xff] }
 0x3aa   :  { %1740 = vmatpush.msrb.mxu3 %v2431_v37  ;;  %v1173_v60 = vmul.f32 %v3014_v28, %v1109_v45  ;;  %v1175_v53 = vmul.f32 %v3063_v62, %v1111_v29  ;;  %v1174_v58 = vmul.f32 %v3049_v26, %v1110_v49  ;;  %v2146_v28 = vsel %vm604_vm2, %v1452_v36, %v2145_v17  ;;  %v2445_v17 = vld [vmem:[#allocation3 + $0xf0] sm:$0xff] }
 0x3ab   :  { %1828 = vperm.xlu1 %2282, %v1170_v51   ;;  %1882 = vperm.xlu2 %2281, %v1172_v19   ;;  %v2147_v26 = vsel %vm606_vm3, %v3195_v30, %v2146_v28  ;;  %v1176_v9 = vmul.f32 %v3060_v40, %v1112_v59  ;;  %v1533_v34 = vperm.slane %v1532_v1, %v2734_v33  ;;  %v2443_v51 = vld [vmem:[#allocation3 + $0xd8] sm:$0xff] }
 0x3ac   :  { %1855 = vperm.xlu0 %2280, %v1171_v39   ;;  %v1177_v54 = vmul.f32 %v3066_v46, %v1113_v24  ;;  %v1803_v5 = vperm.slane %v1802_v0, %v2734_v33  ;;  %v2437_v46 = vld [vmem:[#allocation3 + $0x98] sm:$0xff]  ;;  %v2444_v39 = vld [vmem:[#allocation3 + $0xe0] sm:$0xff] }
 0x3ad   :  { %v1370_v42 = vpop.permute.xlu1 %1369 }
 0x3ae   :  { %v1371_v12 = vperm.slane %v1370_v42, %v2734_v33  ;;  %v1613_v38 = vpop.permute.xlu0 %1612 }
 0x3af   :  { %v1614_v30 = vperm.slane %v1613_v38, %v2734_v33 }
 0x3b0   :  { %v2144_v41 = vsel %vm614_vm7, %v1371_v12, %v2143_v14  ;;  %2237 = vmatmul.msk.f32.vlgmr.msrb.gmra.mxu2 %vm641_vm8, %v1371_v12  ;;  %v2435_v14 = vld [vmem:[#allocation3 + $0x90] sm:$0xff] }
 0x3b1   :  { %2170 = vst.msk [vmem:[%s3345_s6] sm:$0xff] %vm641_vm8, %v2144_v41  ;;  %2247 = vmatmul.msk.f32.vlgmr.msra.gmra.mxu3 %vm641_vm8, %v3211_v32  ;;  %1551 = vmatpush.msrb.mxu2 %v2432_v4  ;;  %v2152_v10 = vsel %vm602_vm1, %v3211_v32, %v1614_v30 }
 0x3b2   :  { %1821 = vmatpush.msra.mxu3 %v2433_v56 }
 0x3b3   :  { %1909 = vperm.xlu1 %2282, %v1173_v60   ;;  %1963 = vperm.xlu2 %2281, %v1175_v53  }
 0x3b4   :  { %1936 = vperm.xlu0 %2280, %v1174_v58   ;;  %v2446_v58 = vld [vmem:[#allocation3 + $0xf8] sm:$0xff] }
 0x3b5   :  { %v1505_v62 = vpop.permute.xlu1 %1504 }
 0x3b6   :  { %v1506_v43 = vperm.slane %v1505_v62, %v2734_v33  ;;  %v1694_v50 = vpop.permute.xlu0 %1693 }
 0x3b7   :  { %v1695_v47 = vperm.slane %v1694_v50, %v2734_v33 }
 0x3b8   :  { %2240 = vmatmul.msk.f32.vlgmr.msra.gmra.mxu2 %vm641_vm8, %v1452_v36  ;;  %2242 = vmatmul.msk.f32.vlgmr.msrb.gmra.mxu1 %vm641_vm8, %v1506_v43  ;;  %v2148_v48 = vsel %vm608_vm4, %v1506_v43, %v2147_v26 }
 0x3b9   :  { %2250 = vmatmul.msk.f32.vlgmr.msrb.gmra.mxu3 %vm641_vm8, %v1722_v23  ;;  %1632 = vmatpush.msra.mxu2 %v2434_v52  ;;  %v2149_v61 = vsel %vm610_vm5, %v1533_v34, %v2148_v48 }
 0x3ba   :  { %1686 = vmatpush.msrb.mxu1 %v2435_v14  ;;  %1902 = vmatpush.msrb.mxu3 %v2436_v63  ;;  %v2150_v15 = vsel %vm612_vm6, %v3202_v16, %v2149_v61 }
 0x3bb   :  { %1990 = vperm.xlu1 %2282, %v1176_v9  }
 0x3bc   :  { %2017 = vperm.xlu0 %2280, %v1177_v54  }
 0x3bd   :  { %v1586_v21 = vpop.permute.xlu1 %1585 }
 0x3be   :  { %v1587_v40 = vperm.slane %v1586_v21, %v2734_v33  ;;  %v1775_v44 = vpop.permute.xlu0 %1774 }
 0x3bf   :  { %v1776_v16 = vperm.slane %v1775_v44, %v2734_v33 }
 0x3c0   :  { %v2151_v3 = vsel %vm614_vm7, %v1587_v40, %v2150_v15  ;;  %2243 = vmatmul.msk.f32.vlgmr.msrb.gmra.mxu2 %vm641_vm8, %v1533_v34  ;;  %2245 = vmatmul.msk.f32.vlgmr.msra.gmra.mxu1 %vm641_vm8, %v1587_v40 }
 0x3c1   :  { %2171 = vst.msk [vmem:[%s3345_s6 + $0x8] sm:$0xff] %vm641_vm8, %v2151_v3  ;;  %2253 = vmatmul.msk.f32.vlgmr.msra.gmra.mxu3 %vm641_vm8, %v1803_v5  ;;  %1713 = vmatpush.msrb.mxu2 %v2437_v46 }
 0x3c2   :  { %1767 = vmatpush.msra.mxu1 %v2438_v27  ;;  %1983 = vmatpush.msra.mxu3 %v2439_v11 }
 0x3c5   :  { %v1667_v13 = vpop.permute.xlu1 %1666 }
 0x3c6   :  { %v1668_v18 = vperm.slane %v1667_v13, %v2734_v33 }
 0x3c8   :  { %2246 = vmatmul.msk.f32.vlgmr.msra.gmra.mxu2 %vm641_vm8, %v1614_v30  ;;  %2248 = vmatmul.msk.f32.vlgmr.msrb.gmra.mxu1 %vm641_vm8, %v1668_v18  ;;  %v2153_v7 = vsel %vm604_vm2, %v1668_v18, %v2152_v10 }
 0x3c9   :  { %1794 = vmatpush.msra.mxu2 %v2440_v8  ;;  %1848 = vmatpush.msrb.mxu1 %v2441_v20  ;;  %v2154_v2 = vsel %vm606_vm3, %v1695_v47, %v2153_v7 }
 0x3ca   :  { %v2155_v25 = vsel %vm608_vm4, %v1722_v23, %v2154_v2 }
 0x3cd   :  { %v1748_v6 = vpop.permute.xlu1 %1747 }
 0x3ce   :  { %v1749_v35 = vperm.slane %v1748_v6, %v2734_v33 }
 0x3d0   :  { %v2156_v55 = vsel %vm610_vm5, %v1749_v35, %v2155_v25  ;;  %2249 = vmatmul.msk.f32.vlgmr.msrb.gmra.mxu2 %vm641_vm8, %v1695_v47  ;;  %2251 = vmatmul.msk.f32.vlgmr.msra.gmra.mxu1 %vm641_vm8, %v1749_v35 }
 0x3d1   :  { %v2157_v22 = vsel %vm612_vm6, %v1776_v16, %v2156_v55  ;;  %1875 = vmatpush.msrb.mxu2 %v2442_v31  ;;  %1929 = vmatpush.msra.mxu1 %v2443_v51 }
 0x3d2   :  { %v2158_v19 = vsel %vm614_vm7, %v1803_v5, %v2157_v22  ;;  %v1202_v1 = vpop.f32.mrf.mxu1 }
 0x3d3   :  { %2172 = vst.msk [vmem:[%s3345_s6 + $0x10] sm:$0xff] %vm641_vm8, %v2158_v19 }
 0x3d8   :  { %2252 = vmatmul.msk.f32.vlgmr.msra.gmra.mxu2 %vm641_vm8, %v1776_v16 }
 0x3d9   :  { %1956 = vmatpush.msra.mxu2 %v2444_v39 }
 0x3da   :  { %v1283_v60 = vpop.f32.mrf.mxu1 }
 0x3db   :  { %v2078_v0 = vrot.slane %v1283_v60, 5 }
 0x3e2   :  { %v1364_v38 = vpop.f32.mrf.mxu1 }
 0x3f0   :  { %v1229_v4 = vpop.f32.mrf.mxu2 }
 0x3f1   :  { %v1256_v12 = vpop.f32.mrf.mxu3  ;;  %v2074_v28 = vrot.slane %v1229_v4, 7 }
 0x3f2   :  { %v2076_v26 = vrot.slane %v1256_v12, 6 }
 0x3f3   :  { %v2075_v9 = vsel %vm602_vm1, %v2074_v28, %v1202_v1 }
 0x3f4   :  { %v2077_v54 = vsel %vm604_vm2, %v2076_v26, %v2075_v9 }
 0x3f5   :  { %v2079_v3 = vsel %vm606_vm3, %v2078_v0, %v2077_v54 }
 0x3f9   :  { %v1310_v52 = vpop.f32.mrf.mxu2 }
 0x3fa   :  { %v2080_v14 = vrot.slane %v1310_v52, 4 }
 0x3fc   :  { %v2081_v50 = vsel %vm608_vm4, %v2080_v14, %v2079_v3 }
 0x401   :  { %v1337_v57 = vpop.f32.mrf.mxu3 }
 0x402   :  { %v2082_v61 = vrot.slane %v1337_v57, 3 }
 0x404   :  { %v2083_v30 = vsel %vm610_vm5, %v2082_v61, %v2081_v50 }
 0x405   :  { %v1883_v37 = vpop.permute.xlu2 %1882 }
 0x406   :  { %v1884_v42 = vperm.slane %v1883_v37, %v2734_v33 }
 0x408   :  { %2256 = vmatmul.msk.f32.vlgmr.msrb.gmra.mxu3 %vm641_vm8, %v1884_v42 }
 0x40d   :  { %v1964_v45 = vpop.permute.xlu2 %1963 }
 0x40e   :  { %v1965_v29 = vperm.slane %v1964_v45, %v2734_v33 }
 0x410   :  { %2259 = vmatmul.msk.f32.vlgmr.msra.gmra.mxu3 %vm641_vm8, %v1965_v29 }
 0x41c   :  { %v1418_v24 = vpop.f32.mrf.mxu3 }
 0x41d   :  { %v1829_v49 = vpop.permute.xlu1 %1828 }
 0x41e   :  { %v1830_v32 = vperm.slane %v1829_v49, %v2734_v33  ;;  %v1856_v41 = vpop.permute.xlu0 %1855  ;;  %v1445_v27 = vpop.f32.mrf.mxu1 }
 0x41f   :  { %v1857_v53 = vperm.slane %v1856_v41, %v2734_v33  ;;  %v2088_v47 = vrot.slane %v1445_v27, 7 }
 0x420   :  { %2254 = vmatmul.msk.f32.vlgmr.msrb.gmra.mxu1 %vm641_vm8, %v1830_v32 }
 0x421   :  { %2255 = vmatmul.msk.f32.vlgmr.msrb.gmra.mxu2 %vm641_vm8, %v1857_v53  ;;  %2010 = vmatpush.msrb.mxu1 %v2445_v17  ;;  %v2159_v56 = vsel %vm602_vm1, %v1857_v53, %v1830_v32  ;;  %v2089_v35 = vsel %vm602_vm1, %v2088_v47, %v1418_v24 }
 0x422   :  { %2037 = vmatpush.msrb.mxu2 %v2446_v58  ;;  %v2160_v23 = vsel %vm604_vm2, %v1884_v42, %v2159_v56 }
 0x424   :  { %v1499_v13 = vpop.f32.mrf.mxu3 }
 0x425   :  { %v1910_v36 = vpop.permute.xlu1 %1909  ;;  %v2092_v25 = vrot.slane %v1499_v13, 5 }
 0x426   :  { %v1911_v62 = vperm.slane %v1910_v36, %v2734_v33  ;;  %v1937_v59 = vpop.permute.xlu0 %1936 }
 0x427   :  { %v1938_v43 = vperm.slane %v1937_v59, %v2734_v33 }
 0x428   :  { %2257 = vmatmul.msk.f32.vlgmr.msra.gmra.mxu1 %vm641_vm8, %v1911_v62  ;;  %v2161_v48 = vsel %vm606_vm3, %v1911_v62, %v2160_v23 }
 0x429   :  { %2258 = vmatmul.msk.f32.vlgmr.msra.gmra.mxu2 %vm641_vm8, %v1938_v43  ;;  %v2162_v34 = vsel %vm608_vm4, %v1938_v43, %v2161_v48 }
 0x42a   :  { %v2163_v5 = vsel %vm610_vm5, %v1965_v29, %v2162_v34 }
 0x42c   :  { %v1580_v2 = vpop.f32.mrf.mxu3 }
 0x42d   :  { %v1991_v63 = vpop.permute.xlu1 %1990  ;;  %v2098_v39 = vrot.slane %v1580_v2, 2 }
 0x42e   :  { %v1992_v21 = vperm.slane %v1991_v63, %v2734_v33  ;;  %v2018_v40 = vpop.permute.xlu0 %2017 }
 0x42f   :  { %v2019_v15 = vperm.slane %v2018_v40, %v2734_v33  ;;  %v2084_v33 = vrot.slane %v1364_v38, 2 }
 0x430   :  { %v2164_v46 = vsel %vm612_vm6, %v1992_v21, %v2163_v5  ;;  %2260 = vmatmul.msk.f32.vlgmr.msrb.gmra.mxu1 %vm641_vm8, %v1992_v21 }
 0x431   :  { %v2165_v11 = vsel %vm614_vm7, %v2019_v15, %v2164_v46  ;;  %2261 = vmatmul.msk.f32.vlgmr.msrb.gmra.mxu2 %vm641_vm8, %v2019_v15  ;;  %v2085_v7 = vsel %vm612_vm6, %v2084_v33, %v2083_v30 }
 0x432   :  { %2173 = vst.msk [vmem:[%s3345_s6 + $0x18] sm:$0xff] %vm641_vm8, %v2165_v11  ;;  %s2530_s6 = smov [#allocation8]  }
 0x433   :  { %v1391_v18 = vpop.f32.mrf.mxu2  ;;  %s2178_s18 = sshll.u32 %s2530_s6, 4  ;;  %s2179_s18 = int_to_ptr.vmem [resolvable:$true] %s2178_s18 }
 0x434   :  { %v2086_v10 = vrot.slane %v1391_v18, 1  ;;  %v1661_v42 = vpop.f32.mrf.mxu3 }
 0x435   :  { %v1526_v20 = vpop.f32.mrf.mxu1  ;;  %v2102_v60 = vrot.slane %v1661_v42, 7 }
 0x436   :  { %v2087_v8 = vsel %vm614_vm7, %v2086_v10, %v2085_v7  ;;  %v2094_v22 = vrot.slane %v1526_v20, 4 }
 0x437   :  { %2134 = vst.msk [vmem:[#allocation8] sm:$0xff] %vm96_vm0, %v2087_v8 }
 0x43b   :  { %v1472_v44 = vpop.f32.mrf.mxu2 }
 0x43c   :  { %v2090_v6 = vrot.slane %v1472_v44, 6  ;;  %v1742_v41 = vpop.f32.mrf.mxu3 }
 0x43d   :  { %v1607_v31 = vpop.f32.mrf.mxu1  ;;  %v2108_v36 = vrot.slane %v1742_v41, 4 }
 0x43e   :  { %v2091_v16 = vsel %vm604_vm2, %v2090_v6, %v2089_v35  ;;  %v2100_v45 = vrot.slane %v1607_v31, 1 }
 0x43f   :  { %v2093_v55 = vsel %vm606_vm3, %v2092_v25, %v2091_v16 }
 0x440   :  { %v2095_v37 = vsel %vm608_vm4, %v2094_v22, %v2093_v55 }
 0x443   :  { %v1553_v51 = vpop.f32.mrf.mxu2 }
 0x444   :  { %v2096_v19 = vrot.slane %v1553_v51, 3  ;;  %v1823_v62 = vpop.f32.mrf.mxu3 }
 0x445   :  { %v1688_v32 = vpop.f32.mrf.mxu1  ;;  %v2114_v38 = vrot.slane %v1823_v62, 1 }
 0x446   :  { %v2097_v29 = vsel %vm610_vm5, %v2096_v19, %v2095_v37  ;;  %v2104_v57 = vrot.slane %v1688_v32, 6 }
 0x447   :  { %v2099_v1 = vsel %vm612_vm6, %v2098_v39, %v2097_v29 }
 0x448   :  { %v2101_v12 = vsel %vm614_vm7, %v2100_v45, %v2099_v1 }
 0x449   :  { %2135 = vst.msk [vmem:[#allocation8 + $0x8] sm:$0xff] %vm96_vm0, %v2101_v12 }
 0x44b   :  { %v1634_v49 = vpop.f32.mrf.mxu2 }
 0x44c   :  { %v2103_v53 = vsel %vm602_vm1, %v2102_v60, %v1634_v49 }
 0x44d   :  { %v2105_v58 = vsel %vm604_vm2, %v2104_v57, %v2103_v53  ;;  %v1769_v28 = vpop.f32.mrf.mxu1 }
 0x44e   :  { %v2110_v43 = vrot.slane %v1769_v28, 3 }
 0x453   :  { %v1715_v4 = vpop.f32.mrf.mxu2 }
 0x454   :  { %v2106_v17 = vrot.slane %v1715_v4, 5 }
 0x456   :  { %v2107_v56 = vsel %vm606_vm3, %v2106_v17, %v2105_v58 }
 0x457   :  { %v2109_v59 = vsel %vm608_vm4, %v2108_v36, %v2107_v56 }
 0x458   :  { %v2111_v26 = vsel %vm610_vm5, %v2110_v43, %v2109_v59 }
 0x45b   :  { %v1796_v24 = vpop.f32.mrf.mxu2 }
 0x45c   :  { %v2112_v23 = vrot.slane %v1796_v24, 2 }
 0x45e   :  { %v2113_v48 = vsel %vm612_vm6, %v2112_v23, %v2111_v26 }
 0x45f   :  { %v2115_v9 = vsel %vm614_vm7, %v2114_v38, %v2113_v48 }
 0x460   :  { %2136 = vst.msk [vmem:[#allocation8 + $0x10] sm:$0xff] %vm96_vm0, %v2115_v9 }
 0x48b   :  { %v1904_v34 = vpop.f32.mrf.mxu3 }
 0x48c   :  { %v2118_v61 = vrot.slane %v1904_v34, 6 }
 0x493   :  { %v1985_v3 = vpop.f32.mrf.mxu3 }
 0x494   :  { %v2124_v11 = vrot.slane %v1985_v3, 3 }
 0x49d   :  { %v1850_v52 = vpop.f32.mrf.mxu1 }
 0x4a4   :  { %v1877_v54 = vpop.f32.mrf.mxu2 }
 0x4a5   :  { %v2116_v14 = vrot.slane %v1877_v54, 7  ;;  %v1931_v63 = vpop.f32.mrf.mxu1 }
 0x4a6   :  { %v2120_v21 = vrot.slane %v1931_v63, 5 }
 0x4a7   :  { %v2117_v0 = vsel %vm602_vm1, %v2116_v14, %v1850_v52 }
 0x4a8   :  { %v2119_v40 = vsel %vm604_vm2, %v2118_v61, %v2117_v0 }
 0x4a9   :  { %v2121_v46 = vsel %vm606_vm3, %v2120_v21, %v2119_v40 }
 0x4ac   :  { %v1958_v5 = vpop.f32.mrf.mxu2 }
 0x4ad   :  { %v2122_v15 = vrot.slane %v1958_v5, 4  ;;  %v2012_v50 = vpop.f32.mrf.mxu1 }
 0x4ae   :  { %v2126_v30 = vrot.slane %v2012_v50, 2 }
 0x4af   :  { %v2123_v27 = vsel %vm608_vm4, %v2122_v15, %v2121_v46 }
 0x4b0   :  { %v2125_v13 = vsel %vm610_vm5, %v2124_v11, %v2123_v27 }
 0x4b1   :  { %v2127_v10 = vsel %vm612_vm6, %v2126_v30, %v2125_v13 }
 0x4b4   :  { %v2039_v33 = vpop.f32.mrf.mxu2 }
 0x4b5   :  { %v2128_v18 = vrot.slane %v2039_v33, 1 }
 0x4b7   :  { %v2129_v7 = vsel %vm614_vm7, %v2128_v18, %v2127_v10 }
 0x4b8   :  { %2137 = vst.msk [vmem:[#allocation8 + $0x18] sm:$0xff] %vm96_vm0, %v2129_v7 }
 0x4b9   :  { %2186 = dma.vmem_to_hbm [thread:$0]  %s2179_s18, 512, %s2181_s21, [#allocation5], %s2526_s29, %s2526_s29, %s2527_s30  }
 0x4ba   :  { %2523 = dma.done.wait [#allocation5], 512  }
 0x4bb   :  { %2524 = vsyncadd [#allocation5], 4294966784 }
 0x4bc   :  { %2195 = vsyncpa [#allocation4], 1 }
 0x4bd   :  { %2196 = vsyncpa [#allocation7], 1 }
 0x4be   :  { %2197 = vsyncpa [#allocation5], 1 }

</bundles_post_ra>
